<compile_context>
chip_gen: v7x
topology: tpu7x:2x2x1
jax: 0.10.0
libtpu: 0.0.40
codegen_flags: <defaults>
</compile_context>

<pallas_src>
import functools

import jax
import jax.numpy as jnp
from jax.experimental import pallas as pl
from jax.experimental.pallas import tpu as pltpu


_VMEM_BLOCK_BUDGET = 8 * 1024 * 1024    # live block bytes per step (pre double-buffer)
_VMEM_LIMIT_BYTES = 48 * 1024 * 1024    # sized under v7x's 64 MiB physical VMEM
_MAX_BATCH_TILE = 8                     # cap static unroll / compile time


def _pick_batch_tile(n, bytes_per_image, budget=_VMEM_BLOCK_BUDGET,
                     max_tile=_MAX_BATCH_TILE):
    """Largest divisor of n (<= max_tile) whose block footprint fits the budget."""
    best = 1
    for d in range(1, n + 1):
        if d > max_tile:
            break
        if n % d == 0 and d * bytes_per_image <= budget:
            best = d
    return best


def _conv_stats_kernel(xpf_ref, w_ref, b_ref, conv_ref, stats_ref,
                       *, H, W, Cin, B):
    """Pass 1: 3x3 conv (pad=1) as 9 accumulated K=Cin matmuls per image.

    xpf_ref : (B, Cin, L)      flattened spatial, zero-padded by W+1 each side
    w_ref   : (9, Cout, Cin)   tap-major folded conv weights
    b_ref   : (Cout, 1)        conv bias
    conv_ref: (B, Cout, H*W)   lane-dense conv activations (written)
    stats_ref:(1, Cout, 2)     per-block [sum, sum_sq] partial BN stats (written)
    """
    Cout = w_ref.shape[1]
    HW = H * W

    # Column-edge masks, hoisted (JAX does not CSE broadcast/iota).
    col = jax.lax.broadcasted_iota(jnp.int32, (1, HW), 1) % W
    at_left = col == 0          # invalid source column for kx == 0 taps
    at_right = col == W - 1     # invalid source column for kx == 2 taps

    s_acc = jnp.zeros((Cout, 1), jnp.float32)
    sq_acc = jnp.zeros((Cout, 1), jnp.float32)

    for b in range(B):                                  # static unroll, B small
        acc = jnp.zeros((Cout, HW), jnp.float32)
        for ky in range(3):
            for kx in range(3):
                off = ky * W + kx                       # static lane offset
                tap = xpf_ref[b, :, off:off + HW]       # (Cin, HW)
                if kx == 0:
                    tap = jnp.where(at_left, 0.0, tap)
                elif kx == 2:
                    tap = jnp.where(at_right, 0.0, tap)
                # (Cout, Cin) @ (Cin, HW) -> (Cout, HW): result is already
                # lane-dense, no accumulator transpose needed.
                acc += jnp.dot(w_ref[ky * 3 + kx], tap,
                               preferred_element_type=jnp.float32)
        acc = acc + b_ref[...]                          # + (Cout, 1) bias
        s_acc += jnp.sum(acc, axis=1, keepdims=True)
        sq_acc += jnp.sum(acc * acc, axis=1, keepdims=True)
        conv_ref[b] = acc                               # unmasked 256-lane stores

    stats_ref[0] = jnp.concatenate([s_acc, sq_acc], axis=1)   # (Cout, 2)


def _bn_prelu_kernel(conv_ref, scale_ref, shift_ref, alpha_ref, o_ref):
    """Pass 2: pure elementwise BN (precomputed scale/shift) + scalar PReLU."""
    y = conv_ref[...] * scale_ref[...] + shift_ref[...]   # (B,Cout,HW)*(Cout,1)
    a = alpha_ref[0, 0]                                   # SMEM scalar slope
    y = jnp.where(y >= 0.0, y, a * y)
    o_ref[...] = y.astype(o_ref.dtype)


def pixel_shuffle_upsampling(x_nchw, w, b, gamma, beta, alpha, *, r=2):
    """Forward pass equivalent to the PyTorch module (training-mode BN).

    x_nchw: (N, Cin, H, W) float32
    w     : (Cout, Cin, 3, 3), Cout = Cin * r**2   (PyTorch OIHW layout)
    b, gamma, beta: (Cout,)
    alpha : scalar PReLU slope
    returns: (N, Cin, H*r, W*r)
    """
    N, Cin, H, W = x_nchw.shape
    Cout = Cin * r * r
    HW = H * W
    L = HW + 2 * (W + 1)
    assert w.shape == (Cout, Cin, 3, 3)

    # Flatten spatial onto the lane axis and zero-pad by W+1 on both sides:
    # tap (ky, kx) of the 3x3/pad-1 conv is then the static lane slice
    # [ky*W + kx : ky*W + kx + H*W]; top/bottom rows read the zero padding,
    # only the left/right column wrap needs an in-kernel mask.
    xf = x_nchw.reshape(N, Cin, HW).astype(jnp.float32)
    xpf = jnp.pad(xf, ((0, 0), (0, 0), (W + 1, W + 1)))        # (N, Cin, L)

    # Weights: OIHW (Cout, Cin, 3, 3) -> (9, Cout, Cin), tap-major.
    w3 = jnp.transpose(w, (2, 3, 0, 1)).reshape(9, Cout, Cin).astype(jnp.float32)
    b2 = b.reshape(Cout, 1).astype(jnp.float32)
    a2 = jnp.asarray(alpha, jnp.float32).reshape(1, 1)

    itemsize = 4
    # pass-1 per-image live bytes: padded input + conv output + accumulator.
    p1_bytes = (Cin * L + 2 * Cout * HW) * itemsize
    B1 = _pick_batch_tile(N, p1_bytes)
    G1 = N // B1

    conv, stats = pl.pallas_call(
        functools.partial(_conv_stats_kernel, H=H, W=W, Cin=Cin, B=B1),
        out_shape=(jax.ShapeDtypeStruct((N, Cout, HW), jnp.float32),
                   jax.ShapeDtypeStruct((G1, Cout, 2), jnp.float32)),
        grid=(G1,),
        in_specs=[pl.BlockSpec((B1, Cin, L), lambda i: (i, 0, 0)),
                  pl.BlockSpec((9, Cout, Cin), lambda i: (0, 0, 0)),
                  pl.BlockSpec((Cout, 1), lambda i: (0, 0))],
        out_specs=(pl.BlockSpec((B1, Cout, HW), lambda i: (i, 0, 0)),
                   pl.BlockSpec((1, Cout, 2), lambda i: (i, 0, 0))),
        compiler_params=pltpu.CompilerParams(
            dimension_semantics=("parallel",),
            vmem_limit_bytes=_VMEM_LIMIT_BYTES),
    )(xpf, w3, b2)

    # Global BN (training-mode, biased variance) scale/shift: tiny, once in XLA.
    count = float(N * HW)
    tot = jnp.sum(stats, axis=0)                               # (Cout, 2)
    mean = tot[:, 0] / count
    var = tot[:, 1] / count - mean * mean
    inv_std = jax.lax.rsqrt(var + 1e-5)
    g = gamma.astype(jnp.float32)
    scale = (g * inv_std).reshape(Cout, 1)
    shift = (beta.astype(jnp.float32) - mean * g * inv_std).reshape(Cout, 1)

    p2_bytes = 2 * Cout * HW * itemsize
    B2 = _pick_batch_tile(N, p2_bytes)
    G2 = N // B2

    y = pl.pallas_call(
        _bn_prelu_kernel,
        out_shape=jax.ShapeDtypeStruct((N, Cout, HW), x_nchw.dtype),
        grid=(G2,),
        in_specs=[pl.BlockSpec((B2, Cout, HW), lambda i: (i, 0, 0)),
                  pl.BlockSpec((Cout, 1), lambda i: (0, 0)),
                  pl.BlockSpec((Cout, 1), lambda i: (0, 0)),
                  pl.BlockSpec(memory_space=pltpu.MemorySpace.SMEM)],
        out_specs=pl.BlockSpec((B2, Cout, HW), lambda i: (i, 0, 0)),
        compiler_params=pltpu.CompilerParams(
            dimension_semantics=("parallel",),
            vmem_limit_bytes=_VMEM_LIMIT_BYTES),
    )(conv, scale, shift, a2)                                  # (N, Cout, HW)

    # PixelShuffle (pure permutation) back to NCHW: cout = c*r^2 + i*r + j.
    # This single XLA transpose is the only output-sized relayout left.
    y = y.reshape(N, Cin, r, r, H, W)
    y = jnp.transpose(y, (0, 1, 4, 2, 5, 3)).reshape(N, Cin, H * r, W * r)
    return y


def _reference(x_nchw, w, b, gamma, beta, alpha, *, r=2):
    """Pure-JAX reference mirroring the PyTorch forward (training-mode BN)."""
    N, Cin, H, W = x_nchw.shape
    y = jax.lax.conv_general_dilated(
        x_nchw, w, window_strides=(1, 1), padding=((1, 1), (1, 1)),
        dimension_numbers=("NCHW", "OIHW", "NCHW"),
    ) + b.reshape(1, -1, 1, 1)
    mean = jnp.mean(y, axis=(0, 2, 3), keepdims=True)
    var = jnp.mean((y - mean) ** 2, axis=(0, 2, 3), keepdims=True)
    y = (y - mean) * jax.lax.rsqrt(var + 1e-5)
    y = y * gamma.reshape(1, -1, 1, 1) + beta.reshape(1, -1, 1, 1)
    Cout = y.shape[1]
    C = Cout // (r * r)
    y = y.reshape(N, C, r, r, H, W)
    y = jnp.transpose(y, (0, 1, 4, 2, 5, 3)).reshape(N, C, H * r, W * r)
    return jnp.where(y >= 0, y, alpha * y)


if __name__ == "__main__":
    N, Cin, H, W = 2, 4, 16, 16
    r = 2
    Cout = Cin * r * r

    key = jax.random.PRNGKey(0)
    kx, kw, kb = jax.random.split(key, 3)
    x = jax.random.normal(kx, (N, Cin, H, W), jnp.float32)
    # Deterministic synthetic parameter init (shapes follow the module __init__).
    w = jax.random.normal(kw, (Cout, Cin, 3, 3), jnp.float32) * 0.1
    b = jax.random.normal(kb, (Cout,), jnp.float32) * 0.1
    gamma = jnp.ones((Cout,), jnp.float32)       # BatchNorm weight init
    beta = jnp.zeros((Cout,), jnp.float32)       # BatchNorm bias init
    alpha = jnp.float32(0.25)                    # PReLU default init

    fwd = jax.jit(functools.partial(pixel_shuffle_upsampling, r=r))
    out = fwd(x, w, b, gamma, beta, alpha)
    jax.block_until_ready(out)

    assert out.shape == (N, Cin, H * r, W * r), out.shape

    ref = _reference(x, w, b, gamma, beta, alpha, r=r)
    assert jnp.allclose(out, ref, atol=2e-3, rtol=2e-3), float(
        jnp.max(jnp.abs(out - ref))
    )

    print("KERNEL_OK")
</pallas_src>

<mosaic_0001>
module attributes {stable_mosaic.version = 11 : i64} {
  func.func @_bn_prelu_kernel(%arg0: i32, %arg1: memref<2x16x256xf32, #tpu.memory_space<vmem>>, %arg2: memref<16x1xf32, #tpu.memory_space<vmem>>, %arg3: memref<16x1xf32, #tpu.memory_space<vmem>>, %arg4: memref<1x1xf32, #tpu.memory_space<smem>>, %arg5: memref<2x16x256xf32, #tpu.memory_space<vmem>>) attributes {dimension_semantics = [#tpu.dimension_semantics<parallel>], iteration_bounds = array<i64: 1>, scalar_prefetch = 0 : i64, scratch_operands = 0 : i64, tpu.core_type = #tpu.core_type<tc>, window_params = [{transform_indices = @transform_0, window_bounds = array<i64: 2, 16, 256>}, {pipeline_mode = #tpu.pipeline_mode<synchronous>, transform_indices = @transform_1, window_bounds = array<i64: 16, 1>}, {pipeline_mode = #tpu.pipeline_mode<synchronous>, transform_indices = @transform_2, window_bounds = array<i64: 16, 1>}, {transform_indices = @transform_3, window_bounds = array<i64: 1, 1>}, {transform_indices = @transform_4, window_bounds = array<i64: 2, 16, 256>}]} {
    %c0 = arith.constant 0 : index
    %c0_0 = arith.constant 0 : index
    %c0_1 = arith.constant 0 : index
    %0 = vector.load %arg1[%c0, %c0_0, %c0_1] : memref<2x16x256xf32, #tpu.memory_space<vmem>>, vector<2x16x256xf32>
    %c0_2 = arith.constant 0 : index
    %c0_3 = arith.constant 0 : index
    %1 = vector.load %arg2[%c0_2, %c0_3] : memref<16x1xf32, #tpu.memory_space<vmem>>, vector<16x1xf32>
    %2 = vector.shape_cast %1 : vector<16x1xf32> to vector<1x16x1xf32>
    %3 = vector.broadcast %2 : vector<1x16x1xf32> to vector<2x16x256xf32>
    %4 = arith.mulf %0, %3 : vector<2x16x256xf32>
    %c0_4 = arith.constant 0 : index
    %c0_5 = arith.constant 0 : index
    %5 = vector.load %arg3[%c0_4, %c0_5] : memref<16x1xf32, #tpu.memory_space<vmem>>, vector<16x1xf32>
    %6 = vector.shape_cast %5 : vector<16x1xf32> to vector<1x16x1xf32>
    %7 = vector.broadcast %6 : vector<1x16x1xf32> to vector<2x16x256xf32>
    %8 = arith.addf %4, %7 : vector<2x16x256xf32>
    %c0_6 = arith.constant 0 : index
    %c0_7 = arith.constant 0 : index
    %9 = memref.load %arg4[%c0_6, %c0_7] : memref<1x1xf32, #tpu.memory_space<smem>>
    %cst = arith.constant 0.000000e+00 : f32
    %10 = vector.broadcast %cst : f32 to vector<2x16x256xf32>
    %11 = arith.cmpf oge, %8, %10 : vector<2x16x256xf32>
    %12 = vector.broadcast %9 : f32 to vector<2x16x256xf32>
    %13 = arith.mulf %12, %8 : vector<2x16x256xf32>
    %14 = arith.select %11, %8, %13 : vector<2x16x256xi1>, vector<2x16x256xf32>
    %c0_8 = arith.constant 0 : index
    %c0_9 = arith.constant 0 : index
    %c0_10 = arith.constant 0 : index
    %15 = vector.load %arg5[%c0_8, %c0_9, %c0_10] : memref<2x16x256xf32, #tpu.memory_space<vmem>>, vector<2x16x256xf32>
    tpu.vector_store %arg5[%c0_8, %c0_9, %c0_10], %14 {strides = array<i32>} : memref<2x16x256xf32, #tpu.memory_space<vmem>>, vector<2x16x256xf32>,
    return
  }
  func.func @transform_0(%arg0: i32) -> (i32, i32, i32) {
    %c0_i32 = arith.constant 0 : i32
    %c0_i32_0 = arith.constant 0 : i32
    %c0_i32_1 = arith.constant 0 : i32
    return %arg0, %c0_i32, %c0_i32_0 : i32, i32, i32
  }
  func.func @transform_1(%arg0: i32) -> (i32, i32) {
    %c0_i32 = arith.constant 0 : i32
    %c0_i32_0 = arith.constant 0 : i32
    %c0_i32_1 = arith.constant 0 : i32
    return %c0_i32, %c0_i32_0 : i32, i32
  }
  func.func @transform_2(%arg0: i32) -> (i32, i32) {
    %c0_i32 = arith.constant 0 : i32
    %c0_i32_0 = arith.constant 0 : i32
    %c0_i32_1 = arith.constant 0 : i32
    return %c0_i32, %c0_i32_0 : i32, i32
  }
  func.func @transform_3(%arg0: i32) -> (i32, i32) {
    %c0_i32 = arith.constant 0 : i32
    %c0_i32_0 = arith.constant 0 : i32
    %c0_i32_1 = arith.constant 0 : i32
    return %c0_i32, %c0_i32_0 : i32, i32
  }
  func.func @transform_4(%arg0: i32) -> (i32, i32, i32) {
    %c0_i32 = arith.constant 0 : i32
    %c0_i32_0 = arith.constant 0 : i32
    %c0_i32_1 = arith.constant 0 : i32
    return %arg0, %c0_i32, %c0_i32_0 : i32, i32, i32
  }
}

module attributes {stable_mosaic.version = 11 : i64} {
  func.func @_conv_stats_kernel(%arg0: i32, %arg1: memref<2x4x290xf32, #tpu.memory_space<vmem>>, %arg2: memref<9x16x4xf32, #tpu.memory_space<vmem>>, %arg3: memref<16x1xf32, #tpu.memory_space<vmem>>, %arg4: memref<2x16x256xf32, #tpu.memory_space<vmem>>, %arg5: memref<1x16x2xf32, #tpu.memory_space<vmem>>) attributes {dimension_semantics = [#tpu.dimension_semantics<parallel>], iteration_bounds = array<i64: 1>, scalar_prefetch = 0 : i64, scratch_operands = 0 : i64, tpu.core_type = #tpu.core_type<tc>, window_params = [{transform_indices = @transform_0, window_bounds = array<i64: 2, 4, 290>}, {pipeline_mode = #tpu.pipeline_mode<synchronous>, transform_indices = @transform_1, window_bounds = array<i64: 9, 16, 4>}, {pipeline_mode = #tpu.pipeline_mode<synchronous>, transform_indices = @transform_2, window_bounds = array<i64: 16, 1>}, {transform_indices = @transform_3, window_bounds = array<i64: 2, 16, 256>}, {transform_indices = @transform_4, window_bounds = array<i64: 1, 16, 2>}]} {
    %0 = tpu.iota {dimensions = array<i32: 1>} : vector<1x256xi32>
    %c16_i32 = arith.constant 16 : i32
    %c0_i32 = arith.constant 0 : i32
    %1 = arith.cmpi eq, %c16_i32, %c0_i32 : i32
    %c1_i32 = arith.constant 1 : i32
    %2 = arith.select %1, %c1_i32, %c16_i32 : i32
    %3 = vector.broadcast %2 : i32 to vector<1x256xi32>
    %4 = arith.remsi %0, %3 : vector<1x256xi32>
    %c0_i32_0 = arith.constant 0 : i32
    %5 = vector.broadcast %c0_i32_0 : i32 to vector<1x256xi32>
    %6 = arith.cmpi ne, %4, %5 : vector<1x256xi32>
    %c0_i32_1 = arith.constant 0 : i32
    %7 = vector.broadcast %c0_i32_1 : i32 to vector<1x256xi32>
    %8 = arith.cmpi slt, %4, %7 : vector<1x256xi32>
    %c0_i32_2 = arith.constant 0 : i32
    %9 = arith.cmpi slt, %2, %c0_i32_2 : i32
    %10 = vector.broadcast %9 : i1 to vector<1x256xi1>
    %11 = vector.broadcast %10 : vector<1x256xi1> to vector<1x256xi1>
    %12 = arith.xori %8, %11 : vector<1x256xi1>
    %13 = arith.andi %12, %6 : vector<1x256xi1>
    %14 = vector.broadcast %2 : i32 to vector<1x256xi32>
    %15 = arith.addi %4, %14 : vector<1x256xi32>
    %16 = arith.select %13, %15, %4 : vector<1x256xi1>, vector<1x256xi32>
    %c0_i32_3 = arith.constant 0 : i32
    %17 = vector.broadcast %c0_i32_3 : i32 to vector<1x256xi32>
    %18 = arith.cmpi eq, %16, %17 : vector<1x256xi32>
    %c15_i32 = arith.constant 15 : i32
    %19 = vector.broadcast %c15_i32 : i32 to vector<1x256xi32>
    %20 = arith.cmpi eq, %16, %19 : vector<1x256xi32>
    %cst = arith.constant 0.000000e+00 : f32
    %21 = vector.broadcast %cst : f32 to vector<16x1xf32>
    %cst_4 = arith.constant 0.000000e+00 : f32
    %22 = vector.broadcast %cst_4 : f32 to vector<16x1xf32>
    %cst_5 = arith.constant 0.000000e+00 : f32
    %23 = vector.broadcast %cst_5 : f32 to vector<16x256xf32>
    %c0 = arith.constant 0 : index
    %c0_6 = arith.constant 0 : index
    %c0_7 = arith.constant 0 : index
    %24 = vector.load %arg1[%c0, %c0_6, %c0_7] : memref<2x4x290xf32, #tpu.memory_space<vmem>>, vector<1x4x256xf32>
    %25 = vector.shape_cast %24 : vector<1x4x256xf32> to vector<4x256xf32>
    %cst_8 = arith.constant 0.000000e+00 : f32
    %26 = vector.shape_cast %18 : vector<1x256xi1> to vector<1x256xi1>
    %27 = vector.broadcast %26 : vector<1x256xi1> to vector<4x256xi1>
    %28 = vector.broadcast %cst_8 : f32 to vector<4x256xf32>
    %29 = arith.select %27, %28, %25 : vector<4x256xi1>, vector<4x256xf32>
    %c0_9 = arith.constant 0 : index
    %c0_10 = arith.constant 0 : index
    %c0_11 = arith.constant 0 : index
    %30 = vector.load %arg2[%c0_9, %c0_10, %c0_11] : memref<9x16x4xf32, #tpu.memory_space<vmem>>, vector<1x16x4xf32>
    %31 = vector.shape_cast %30 : vector<1x16x4xf32> to vector<16x4xf32>
    %cst_12 = arith.constant dense<0.000000e+00> : vector<16x256xf32>
    %32 = tpu.matmul %31, %29, %cst_12 {dimension_numbers = #tpu.dot_dimension_numbers<[1], [0], [0], [1], [0, 0, 1, 1], [], []>} : vector<16x4xf32>, vector<4x256xf32>, vector<16x256xf32> -> vector<16x256xf32>
    %33 = arith.addf %23, %32 : vector<16x256xf32>
    %c0_13 = arith.constant 0 : index
    %c0_14 = arith.constant 0 : index
    %c1 = arith.constant 1 : index
    %34 = vector.load %arg1[%c0_13, %c0_14, %c1] : memref<2x4x290xf32, #tpu.memory_space<vmem>>, vector<1x4x256xf32>
    %35 = vector.shape_cast %34 : vector<1x4x256xf32> to vector<4x256xf32>
    %c1_15 = arith.constant 1 : index
    %c0_16 = arith.constant 0 : index
    %c0_17 = arith.constant 0 : index
    %36 = vector.load %arg2[%c1_15, %c0_16, %c0_17] : memref<9x16x4xf32, #tpu.memory_space<vmem>>, vector<1x16x4xf32>
    %37 = vector.shape_cast %36 : vector<1x16x4xf32> to vector<16x4xf32>
    %cst_18 = arith.constant dense<0.000000e+00> : vector<16x256xf32>
    %38 = tpu.matmul %37, %35, %cst_18 {dimension_numbers = #tpu.dot_dimension_numbers<[1], [0], [0], [1], [0, 0, 1, 1], [], []>} : vector<16x4xf32>, vector<4x256xf32>, vector<16x256xf32> -> vector<16x256xf32>
    %39 = arith.addf %33, %38 : vector<16x256xf32>
    %c0_19 = arith.constant 0 : index
    %c0_20 = arith.constant 0 : index
    %c2 = arith.constant 2 : index
    %40 = vector.load %arg1[%c0_19, %c0_20, %c2] : memref<2x4x290xf32, #tpu.memory_space<vmem>>, vector<1x4x256xf32>
    %41 = vector.shape_cast %40 : vector<1x4x256xf32> to vector<4x256xf32>
    %cst_21 = arith.constant 0.000000e+00 : f32
    %42 = vector.shape_cast %20 : vector<1x256xi1> to vector<1x256xi1>
    %43 = vector.broadcast %42 : vector<1x256xi1> to vector<4x256xi1>
    %44 = vector.broadcast %cst_21 : f32 to vector<4x256xf32>
    %45 = arith.select %43, %44, %41 : vector<4x256xi1>, vector<4x256xf32>
    %c2_22 = arith.constant 2 : index
    %c0_23 = arith.constant 0 : index
    %c0_24 = arith.constant 0 : index
    %46 = vector.load %arg2[%c2_22, %c0_23, %c0_24] : memref<9x16x4xf32, #tpu.memory_space<vmem>>, vector<1x16x4xf32>
    %47 = vector.shape_cast %46 : vector<1x16x4xf32> to vector<16x4xf32>
    %cst_25 = arith.constant dense<0.000000e+00> : vector<16x256xf32>
    %48 = tpu.matmul %47, %45, %cst_25 {dimension_numbers = #tpu.dot_dimension_numbers<[1], [0], [0], [1], [0, 0, 1, 1], [], []>} : vector<16x4xf32>, vector<4x256xf32>, vector<16x256xf32> -> vector<16x256xf32>
    %49 = arith.addf %39, %48 : vector<16x256xf32>
    %c0_26 = arith.constant 0 : index
    %c0_27 = arith.constant 0 : index
    %c16 = arith.constant 16 : index
    %50 = vector.load %arg1[%c0_26, %c0_27, %c16] : memref<2x4x290xf32, #tpu.memory_space<vmem>>, vector<1x4x256xf32>
    %51 = vector.shape_cast %50 : vector<1x4x256xf32> to vector<4x256xf32>
    %cst_28 = arith.constant 0.000000e+00 : f32
    %52 = vector.shape_cast %18 : vector<1x256xi1> to vector<1x256xi1>
    %53 = vector.broadcast %52 : vector<1x256xi1> to vector<4x256xi1>
    %54 = vector.broadcast %cst_28 : f32 to vector<4x256xf32>
    %55 = arith.select %53, %54, %51 : vector<4x256xi1>, vector<4x256xf32>
    %c3 = arith.constant 3 : index
    %c0_29 = arith.constant 0 : index
    %c0_30 = arith.constant 0 : index
    %56 = vector.load %arg2[%c3, %c0_29, %c0_30] : memref<9x16x4xf32, #tpu.memory_space<vmem>>, vector<1x16x4xf32>
    %57 = vector.shape_cast %56 : vector<1x16x4xf32> to vector<16x4xf32>
    %cst_31 = arith.constant dense<0.000000e+00> : vector<16x256xf32>
    %58 = tpu.matmul %57, %55, %cst_31 {dimension_numbers = #tpu.dot_dimension_numbers<[1], [0], [0], [1], [0, 0, 1, 1], [], []>} : vector<16x4xf32>, vector<4x256xf32>, vector<16x256xf32> -> vector<16x256xf32>
    %59 = arith.addf %49, %58 : vector<16x256xf32>
    %c0_32 = arith.constant 0 : index
    %c0_33 = arith.constant 0 : index
    %c17 = arith.constant 17 : index
    %60 = vector.load %arg1[%c0_32, %c0_33, %c17] : memref<2x4x290xf32, #tpu.memory_space<vmem>>, vector<1x4x256xf32>
    %61 = vector.shape_cast %60 : vector<1x4x256xf32> to vector<4x256xf32>
    %c4 = arith.constant 4 : index
    %c0_34 = arith.constant 0 : index
    %c0_35 = arith.constant 0 : index
    %62 = vector.load %arg2[%c4, %c0_34, %c0_35] : memref<9x16x4xf32, #tpu.memory_space<vmem>>, vector<1x16x4xf32>
    %63 = vector.shape_cast %62 : vector<1x16x4xf32> to vector<16x4xf32>
    %cst_36 = arith.constant dense<0.000000e+00> : vector<16x256xf32>
    %64 = tpu.matmul %63, %61, %cst_36 {dimension_numbers = #tpu.dot_dimension_numbers<[1], [0], [0], [1], [0, 0, 1, 1], [], []>} : vector<16x4xf32>, vector<4x256xf32>, vector<16x256xf32> -> vector<16x256xf32>
    %65 = arith.addf %59, %64 : vector<16x256xf32>
    %c0_37 = arith.constant 0 : index
    %c0_38 = arith.constant 0 : index
    %c18 = arith.constant 18 : index
    %66 = vector.load %arg1[%c0_37, %c0_38, %c18] : memref<2x4x290xf32, #tpu.memory_space<vmem>>, vector<1x4x256xf32>
    %67 = vector.shape_cast %66 : vector<1x4x256xf32> to vector<4x256xf32>
    %cst_39 = arith.constant 0.000000e+00 : f32
    %68 = vector.shape_cast %20 : vector<1x256xi1> to vector<1x256xi1>
    %69 = vector.broadcast %68 : vector<1x256xi1> to vector<4x256xi1>
    %70 = vector.broadcast %cst_39 : f32 to vector<4x256xf32>
    %71 = arith.select %69, %70, %67 : vector<4x256xi1>, vector<4x256xf32>
    %c5 = arith.constant 5 : index
    %c0_40 = arith.constant 0 : index
    %c0_41 = arith.constant 0 : index
    %72 = vector.load %arg2[%c5, %c0_40, %c0_41] : memref<9x16x4xf32, #tpu.memory_space<vmem>>, vector<1x16x4xf32>
    %73 = vector.shape_cast %72 : vector<1x16x4xf32> to vector<16x4xf32>
    %cst_42 = arith.constant dense<0.000000e+00> : vector<16x256xf32>
    %74 = tpu.matmul %73, %71, %cst_42 {dimension_numbers = #tpu.dot_dimension_numbers<[1], [0], [0], [1], [0, 0, 1, 1], [], []>} : vector<16x4xf32>, vector<4x256xf32>, vector<16x256xf32> -> vector<16x256xf32>
    %75 = arith.addf %65, %74 : vector<16x256xf32>
    %c0_43 = arith.constant 0 : index
    %c0_44 = arith.constant 0 : index
    %c32 = arith.constant 32 : index
    %76 = vector.load %arg1[%c0_43, %c0_44, %c32] : memref<2x4x290xf32, #tpu.memory_space<vmem>>, vector<1x4x256xf32>
    %77 = vector.shape_cast %76 : vector<1x4x256xf32> to vector<4x256xf32>
    %cst_45 = arith.constant 0.000000e+00 : f32
    %78 = vector.shape_cast %18 : vector<1x256xi1> to vector<1x256xi1>
    %79 = vector.broadcast %78 : vector<1x256xi1> to vector<4x256xi1>
    %80 = vector.broadcast %cst_45 : f32 to vector<4x256xf32>
    %81 = arith.select %79, %80, %77 : vector<4x256xi1>, vector<4x256xf32>
    %c6 = arith.constant 6 : index
    %c0_46 = arith.constant 0 : index
    %c0_47 = arith.constant 0 : index
    %82 = vector.load %arg2[%c6, %c0_46, %c0_47] : memref<9x16x4xf32, #tpu.memory_space<vmem>>, vector<1x16x4xf32>
    %83 = vector.shape_cast %82 : vector<1x16x4xf32> to vector<16x4xf32>
    %cst_48 = arith.constant dense<0.000000e+00> : vector<16x256xf32>
    %84 = tpu.matmul %83, %81, %cst_48 {dimension_numbers = #tpu.dot_dimension_numbers<[1], [0], [0], [1], [0, 0, 1, 1], [], []>} : vector<16x4xf32>, vector<4x256xf32>, vector<16x256xf32> -> vector<16x256xf32>
    %85 = arith.addf %75, %84 : vector<16x256xf32>
    %c0_49 = arith.constant 0 : index
    %c0_50 = arith.constant 0 : index
    %c33 = arith.constant 33 : index
    %86 = vector.load %arg1[%c0_49, %c0_50, %c33] : memref<2x4x290xf32, #tpu.memory_space<vmem>>, vector<1x4x256xf32>
    %87 = vector.shape_cast %86 : vector<1x4x256xf32> to vector<4x256xf32>
    %c7 = arith.constant 7 : index
    %c0_51 = arith.constant 0 : index
    %c0_52 = arith.constant 0 : index
    %88 = vector.load %arg2[%c7, %c0_51, %c0_52] : memref<9x16x4xf32, #tpu.memory_space<vmem>>, vector<1x16x4xf32>
    %89 = vector.shape_cast %88 : vector<1x16x4xf32> to vector<16x4xf32>
    %cst_53 = arith.constant dense<0.000000e+00> : vector<16x256xf32>
    %90 = tpu.matmul %89, %87, %cst_53 {dimension_numbers = #tpu.dot_dimension_numbers<[1], [0], [0], [1], [0, 0, 1, 1], [], []>} : vector<16x4xf32>, vector<4x256xf32>, vector<16x256xf32> -> vector<16x256xf32>
    %91 = arith.addf %85, %90 : vector<16x256xf32>
    %c0_54 = arith.constant 0 : index
    %c0_55 = arith.constant 0 : index
    %c34 = arith.constant 34 : index
    %92 = vector.load %arg1[%c0_54, %c0_55, %c34] : memref<2x4x290xf32, #tpu.memory_space<vmem>>, vector<1x4x256xf32>
    %93 = vector.shape_cast %92 : vector<1x4x256xf32> to vector<4x256xf32>
    %cst_56 = arith.constant 0.000000e+00 : f32
    %94 = vector.shape_cast %20 : vector<1x256xi1> to vector<1x256xi1>
    %95 = vector.broadcast %94 : vector<1x256xi1> to vector<4x256xi1>
    %96 = vector.broadcast %cst_56 : f32 to vector<4x256xf32>
    %97 = arith.select %95, %96, %93 : vector<4x256xi1>, vector<4x256xf32>
    %c8 = arith.constant 8 : index
    %c0_57 = arith.constant 0 : index
    %c0_58 = arith.constant 0 : index
    %98 = vector.load %arg2[%c8, %c0_57, %c0_58] : memref<9x16x4xf32, #tpu.memory_space<vmem>>, vector<1x16x4xf32>
    %99 = vector.shape_cast %98 : vector<1x16x4xf32> to vector<16x4xf32>
    %cst_59 = arith.constant dense<0.000000e+00> : vector<16x256xf32>
    %100 = tpu.matmul %99, %97, %cst_59 {dimension_numbers = #tpu.dot_dimension_numbers<[1], [0], [0], [1], [0, 0, 1, 1], [], []>} : vector<16x4xf32>, vector<4x256xf32>, vector<16x256xf32> -> vector<16x256xf32>
    %101 = arith.addf %91, %100 : vector<16x256xf32>
    %c0_60 = arith.constant 0 : index
    %c0_61 = arith.constant 0 : index
    %102 = vector.load %arg3[%c0_60, %c0_61] : memref<16x1xf32, #tpu.memory_space<vmem>>, vector<16x1xf32>
    %103 = vector.broadcast %102 : vector<16x1xf32> to vector<16x256xf32>
    %104 = arith.addf %101, %103 : vector<16x256xf32>
    %cst_62 = arith.constant dense<0.000000e+00> : vector<16xf32>
    %105 = vector.multi_reduction <add>, %104, %cst_62 [1] : vector<16x256xf32> to vector<16xf32>
    %106 = vector.shape_cast %105 : vector<16xf32> to vector<16x1xf32>
    %107 = arith.addf %21, %106 : vector<16x1xf32>
    %108 = arith.mulf %104, %104 : vector<16x256xf32>
    %cst_63 = arith.constant dense<0.000000e+00> : vector<16xf32>
    %109 = vector.multi_reduction <add>, %108, %cst_63 [1] : vector<16x256xf32> to vector<16xf32>
    %110 = vector.shape_cast %109 : vector<16xf32> to vector<16x1xf32>
    %111 = arith.addf %22, %110 : vector<16x1xf32>
    %c0_64 = arith.constant 0 : index
    %c0_65 = arith.constant 0 : index
    %c0_66 = arith.constant 0 : index
    %112 = vector.load %arg4[%c0_64, %c0_65, %c0_66] : memref<2x16x256xf32, #tpu.memory_space<vmem>>, vector<1x16x256xf32>
    %113 = vector.shape_cast %112 : vector<1x16x256xf32> to vector<16x256xf32>
    %114 = vector.shape_cast %104 : vector<16x256xf32> to vector<1x16x256xf32>
    tpu.vector_store %arg4[%c0_64, %c0_65, %c0_66], %114 {strides = array<i32>} : memref<2x16x256xf32, #tpu.memory_space<vmem>>, vector<1x16x256xf32>,
    %cst_67 = arith.constant 0.000000e+00 : f32
    %115 = vector.broadcast %cst_67 : f32 to vector<16x256xf32>
    %c1_68 = arith.constant 1 : index
    %c0_69 = arith.constant 0 : index
    %c0_70 = arith.constant 0 : index
    %116 = vector.load %arg1[%c1_68, %c0_69, %c0_70] : memref<2x4x290xf32, #tpu.memory_space<vmem>>, vector<1x4x256xf32>
    %117 = vector.shape_cast %116 : vector<1x4x256xf32> to vector<4x256xf32>
    %cst_71 = arith.constant 0.000000e+00 : f32
    %118 = vector.shape_cast %18 : vector<1x256xi1> to vector<1x256xi1>
    %119 = vector.broadcast %118 : vector<1x256xi1> to vector<4x256xi1>
    %120 = vector.broadcast %cst_71 : f32 to vector<4x256xf32>
    %121 = arith.select %119, %120, %117 : vector<4x256xi1>, vector<4x256xf32>
    %c0_72 = arith.constant 0 : index
    %c0_73 = arith.constant 0 : index
    %c0_74 = arith.constant 0 : index
    %122 = vector.load %arg2[%c0_72, %c0_73, %c0_74] : memref<9x16x4xf32, #tpu.memory_space<vmem>>, vector<1x16x4xf32>
    %123 = vector.shape_cast %122 : vector<1x16x4xf32> to vector<16x4xf32>
    %cst_75 = arith.constant dense<0.000000e+00> : vector<16x256xf32>
    %124 = tpu.matmul %123, %121, %cst_75 {dimension_numbers = #tpu.dot_dimension_numbers<[1], [0], [0], [1], [0, 0, 1, 1], [], []>} : vector<16x4xf32>, vector<4x256xf32>, vector<16x256xf32> -> vector<16x256xf32>
    %125 = arith.addf %115, %124 : vector<16x256xf32>
    %c1_76 = arith.constant 1 : index
    %c0_77 = arith.constant 0 : index
    %c1_78 = arith.constant 1 : index
    %126 = vector.load %arg1[%c1_76, %c0_77, %c1_78] : memref<2x4x290xf32, #tpu.memory_space<vmem>>, vector<1x4x256xf32>
    %127 = vector.shape_cast %126 : vector<1x4x256xf32> to vector<4x256xf32>
    %c1_79 = arith.constant 1 : index
    %c0_80 = arith.constant 0 : index
    %c0_81 = arith.constant 0 : index
    %128 = vector.load %arg2[%c1_79, %c0_80, %c0_81] : memref<9x16x4xf32, #tpu.memory_space<vmem>>, vector<1x16x4xf32>
    %129 = vector.shape_cast %128 : vector<1x16x4xf32> to vector<16x4xf32>
    %cst_82 = arith.constant dense<0.000000e+00> : vector<16x256xf32>
    %130 = tpu.matmul %129, %127, %cst_82 {dimension_numbers = #tpu.dot_dimension_numbers<[1], [0], [0], [1], [0, 0, 1, 1], [], []>} : vector<16x4xf32>, vector<4x256xf32>, vector<16x256xf32> -> vector<16x256xf32>
    %131 = arith.addf %125, %130 : vector<16x256xf32>
    %c1_83 = arith.constant 1 : index
    %c0_84 = arith.constant 0 : index
    %c2_85 = arith.constant 2 : index
    %132 = vector.load %arg1[%c1_83, %c0_84, %c2_85] : memref<2x4x290xf32, #tpu.memory_space<vmem>>, vector<1x4x256xf32>
    %133 = vector.shape_cast %132 : vector<1x4x256xf32> to vector<4x256xf32>
    %cst_86 = arith.constant 0.000000e+00 : f32
    %134 = vector.shape_cast %20 : vector<1x256xi1> to vector<1x256xi1>
    %135 = vector.broadcast %134 : vector<1x256xi1> to vector<4x256xi1>
    %136 = vector.broadcast %cst_86 : f32 to vector<4x256xf32>
    %137 = arith.select %135, %136, %133 : vector<4x256xi1>, vector<4x256xf32>
    %c2_87 = arith.constant 2 : index
    %c0_88 = arith.constant 0 : index
    %c0_89 = arith.constant 0 : index
    %138 = vector.load %arg2[%c2_87, %c0_88, %c0_89] : memref<9x16x4xf32, #tpu.memory_space<vmem>>, vector<1x16x4xf32>
    %139 = vector.shape_cast %138 : vector<1x16x4xf32> to vector<16x4xf32>
    %cst_90 = arith.constant dense<0.000000e+00> : vector<16x256xf32>
    %140 = tpu.matmul %139, %137, %cst_90 {dimension_numbers = #tpu.dot_dimension_numbers<[1], [0], [0], [1], [0, 0, 1, 1], [], []>} : vector<16x4xf32>, vector<4x256xf32>, vector<16x256xf32> -> vector<16x256xf32>
    %141 = arith.addf %131, %140 : vector<16x256xf32>
    %c1_91 = arith.constant 1 : index
    %c0_92 = arith.constant 0 : index
    %c16_93 = arith.constant 16 : index
    %142 = vector.load %arg1[%c1_91, %c0_92, %c16_93] : memref<2x4x290xf32, #tpu.memory_space<vmem>>, vector<1x4x256xf32>
    %143 = vector.shape_cast %142 : vector<1x4x256xf32> to vector<4x256xf32>
    %cst_94 = arith.constant 0.000000e+00 : f32
    %144 = vector.shape_cast %18 : vector<1x256xi1> to vector<1x256xi1>
    %145 = vector.broadcast %144 : vector<1x256xi1> to vector<4x256xi1>
    %146 = vector.broadcast %cst_94 : f32 to vector<4x256xf32>
    %147 = arith.select %145, %146, %143 : vector<4x256xi1>, vector<4x256xf32>
    %c3_95 = arith.constant 3 : index
    %c0_96 = arith.constant 0 : index
    %c0_97 = arith.constant 0 : index
    %148 = vector.load %arg2[%c3_95, %c0_96, %c0_97] : memref<9x16x4xf32, #tpu.memory_space<vmem>>, vector<1x16x4xf32>
    %149 = vector.shape_cast %148 : vector<1x16x4xf32> to vector<16x4xf32>
    %cst_98 = arith.constant dense<0.000000e+00> : vector<16x256xf32>
    %150 = tpu.matmul %149, %147, %cst_98 {dimension_numbers = #tpu.dot_dimension_numbers<[1], [0], [0], [1], [0, 0, 1, 1], [], []>} : vector<16x4xf32>, vector<4x256xf32>, vector<16x256xf32> -> vector<16x256xf32>
    %151 = arith.addf %141, %150 : vector<16x256xf32>
    %c1_99 = arith.constant 1 : index
    %c0_100 = arith.constant 0 : index
    %c17_101 = arith.constant 17 : index
    %152 = vector.load %arg1[%c1_99, %c0_100, %c17_101] : memref<2x4x290xf32, #tpu.memory_space<vmem>>, vector<1x4x256xf32>
    %153 = vector.shape_cast %152 : vector<1x4x256xf32> to vector<4x256xf32>
    %c4_102 = arith.constant 4 : index
    %c0_103 = arith.constant 0 : index
    %c0_104 = arith.constant 0 : index
    %154 = vector.load %arg2[%c4_102, %c0_103, %c0_104] : memref<9x16x4xf32, #tpu.memory_space<vmem>>, vector<1x16x4xf32>
    %155 = vector.shape_cast %154 : vector<1x16x4xf32> to vector<16x4xf32>
    %cst_105 = arith.constant dense<0.000000e+00> : vector<16x256xf32>
    %156 = tpu.matmul %155, %153, %cst_105 {dimension_numbers = #tpu.dot_dimension_numbers<[1], [0], [0], [1], [0, 0, 1, 1], [], []>} : vector<16x4xf32>, vector<4x256xf32>, vector<16x256xf32> -> vector<16x256xf32>
    %157 = arith.addf %151, %156 : vector<16x256xf32>
    %c1_106 = arith.constant 1 : index
    %c0_107 = arith.constant 0 : index
    %c18_108 = arith.constant 18 : index
    %158 = vector.load %arg1[%c1_106, %c0_107, %c18_108] : memref<2x4x290xf32, #tpu.memory_space<vmem>>, vector<1x4x256xf32>
    %159 = vector.shape_cast %158 : vector<1x4x256xf32> to vector<4x256xf32>
    %cst_109 = arith.constant 0.000000e+00 : f32
    %160 = vector.shape_cast %20 : vector<1x256xi1> to vector<1x256xi1>
    %161 = vector.broadcast %160 : vector<1x256xi1> to vector<4x256xi1>
    %162 = vector.broadcast %cst_109 : f32 to vector<4x256xf32>
    %163 = arith.select %161, %162, %159 : vector<4x256xi1>, vector<4x256xf32>
    %c5_110 = arith.constant 5 : index
    %c0_111 = arith.constant 0 : index
    %c0_112 = arith.constant 0 : index
    %164 = vector.load %arg2[%c5_110, %c0_111, %c0_112] : memref<9x16x4xf32, #tpu.memory_space<vmem>>, vector<1x16x4xf32>
    %165 = vector.shape_cast %164 : vector<1x16x4xf32> to vector<16x4xf32>
    %cst_113 = arith.constant dense<0.000000e+00> : vector<16x256xf32>
    %166 = tpu.matmul %165, %163, %cst_113 {dimension_numbers = #tpu.dot_dimension_numbers<[1], [0], [0], [1], [0, 0, 1, 1], [], []>} : vector<16x4xf32>, vector<4x256xf32>, vector<16x256xf32> -> vector<16x256xf32>
    %167 = arith.addf %157, %166 : vector<16x256xf32>
    %c1_114 = arith.constant 1 : index
    %c0_115 = arith.constant 0 : index
    %c32_116 = arith.constant 32 : index
    %168 = vector.load %arg1[%c1_114, %c0_115, %c32_116] : memref<2x4x290xf32, #tpu.memory_space<vmem>>, vector<1x4x256xf32>
    %169 = vector.shape_cast %168 : vector<1x4x256xf32> to vector<4x256xf32>
    %cst_117 = arith.constant 0.000000e+00 : f32
    %170 = vector.shape_cast %18 : vector<1x256xi1> to vector<1x256xi1>
    %171 = vector.broadcast %170 : vector<1x256xi1> to vector<4x256xi1>
    %172 = vector.broadcast %cst_117 : f32 to vector<4x256xf32>
    %173 = arith.select %171, %172, %169 : vector<4x256xi1>, vector<4x256xf32>
    %c6_118 = arith.constant 6 : index
    %c0_119 = arith.constant 0 : index
    %c0_120 = arith.constant 0 : index
    %174 = vector.load %arg2[%c6_118, %c0_119, %c0_120] : memref<9x16x4xf32, #tpu.memory_space<vmem>>, vector<1x16x4xf32>
    %175 = vector.shape_cast %174 : vector<1x16x4xf32> to vector<16x4xf32>
    %cst_121 = arith.constant dense<0.000000e+00> : vector<16x256xf32>
    %176 = tpu.matmul %175, %173, %cst_121 {dimension_numbers = #tpu.dot_dimension_numbers<[1], [0], [0], [1], [0, 0, 1, 1], [], []>} : vector<16x4xf32>, vector<4x256xf32>, vector<16x256xf32> -> vector<16x256xf32>
    %177 = arith.addf %167, %176 : vector<16x256xf32>
    %c1_122 = arith.constant 1 : index
    %c0_123 = arith.constant 0 : index
    %c33_124 = arith.constant 33 : index
    %178 = vector.load %arg1[%c1_122, %c0_123, %c33_124] : memref<2x4x290xf32, #tpu.memory_space<vmem>>, vector<1x4x256xf32>
    %179 = vector.shape_cast %178 : vector<1x4x256xf32> to vector<4x256xf32>
    %c7_125 = arith.constant 7 : index
    %c0_126 = arith.constant 0 : index
    %c0_127 = arith.constant 0 : index
    %180 = vector.load %arg2[%c7_125, %c0_126, %c0_127] : memref<9x16x4xf32, #tpu.memory_space<vmem>>, vector<1x16x4xf32>
    %181 = vector.shape_cast %180 : vector<1x16x4xf32> to vector<16x4xf32>
    %cst_128 = arith.constant dense<0.000000e+00> : vector<16x256xf32>
    %182 = tpu.matmul %181, %179, %cst_128 {dimension_numbers = #tpu.dot_dimension_numbers<[1], [0], [0], [1], [0, 0, 1, 1], [], []>} : vector<16x4xf32>, vector<4x256xf32>, vector<16x256xf32> -> vector<16x256xf32>
    %183 = arith.addf %177, %182 : vector<16x256xf32>
    %c1_129 = arith.constant 1 : index
    %c0_130 = arith.constant 0 : index
    %c34_131 = arith.constant 34 : index
    %184 = vector.load %arg1[%c1_129, %c0_130, %c34_131] : memref<2x4x290xf32, #tpu.memory_space<vmem>>, vector<1x4x256xf32>
    %185 = vector.shape_cast %184 : vector<1x4x256xf32> to vector<4x256xf32>
    %cst_132 = arith.constant 0.000000e+00 : f32
    %186 = vector.shape_cast %20 : vector<1x256xi1> to vector<1x256xi1>
    %187 = vector.broadcast %186 : vector<1x256xi1> to vector<4x256xi1>
    %188 = vector.broadcast %cst_132 : f32 to vector<4x256xf32>
    %189 = arith.select %187, %188, %185 : vector<4x256xi1>, vector<4x256xf32>
    %c8_133 = arith.constant 8 : index
    %c0_134 = arith.constant 0 : index
    %c0_135 = arith.constant 0 : index
    %190 = vector.load %arg2[%c8_133, %c0_134, %c0_135] : memref<9x16x4xf32, #tpu.memory_space<vmem>>, vector<1x16x4xf32>
    %191 = vector.shape_cast %190 : vector<1x16x4xf32> to vector<16x4xf32>
    %cst_136 = arith.constant dense<0.000000e+00> : vector<16x256xf32>
    %192 = tpu.matmul %191, %189, %cst_136 {dimension_numbers = #tpu.dot_dimension_numbers<[1], [0], [0], [1], [0, 0, 1, 1], [], []>} : vector<16x4xf32>, vector<4x256xf32>, vector<16x256xf32> -> vector<16x256xf32>
    %193 = arith.addf %183, %192 : vector<16x256xf32>
    %c0_137 = arith.constant 0 : index
    %c0_138 = arith.constant 0 : index
    %194 = vector.load %arg3[%c0_137, %c0_138] : memref<16x1xf32, #tpu.memory_space<vmem>>, vector<16x1xf32>
    %195 = vector.broadcast %194 : vector<16x1xf32> to vector<16x256xf32>
    %196 = arith.addf %193, %195 : vector<16x256xf32>
    %cst_139 = arith.constant dense<0.000000e+00> : vector<16xf32>
    %197 = vector.multi_reduction <add>, %196, %cst_139 [1] : vector<16x256xf32> to vector<16xf32>
    %198 = vector.shape_cast %197 : vector<16xf32> to vector<16x1xf32>
    %199 = arith.addf %107, %198 : vector<16x1xf32>
    %200 = arith.mulf %196, %196 : vector<16x256xf32>
    %cst_140 = arith.constant dense<0.000000e+00> : vector<16xf32>
    %201 = vector.multi_reduction <add>, %200, %cst_140 [1] : vector<16x256xf32> to vector<16xf32>
    %202 = vector.shape_cast %201 : vector<16xf32> to vector<16x1xf32>
    %203 = arith.addf %111, %202 : vector<16x1xf32>
    %c1_141 = arith.constant 1 : index
    %c0_142 = arith.constant 0 : index
    %c0_143 = arith.constant 0 : index
    %204 = vector.load %arg4[%c1_141, %c0_142, %c0_143] : memref<2x16x256xf32, #tpu.memory_space<vmem>>, vector<1x16x256xf32>
    %205 = vector.shape_cast %204 : vector<1x16x256xf32> to vector<16x256xf32>
    %206 = vector.shape_cast %196 : vector<16x256xf32> to vector<1x16x256xf32>
    tpu.vector_store %arg4[%c1_141, %c0_142, %c0_143], %206 {strides = array<i32>} : memref<2x16x256xf32, #tpu.memory_space<vmem>>, vector<1x16x256xf32>,
    %207 = tpu.concatenate %199, %203 in 1 : vector<16x1xf32>, vector<16x1xf32> -> vector<16x2xf32>
    %c0_144 = arith.constant 0 : index
    %c0_145 = arith.constant 0 : index
    %c0_146 = arith.constant 0 : index
    %208 = vector.load %arg5[%c0_144, %c0_145, %c0_146] : memref<1x16x2xf32, #tpu.memory_space<vmem>>, vector<1x16x2xf32>
    %209 = vector.shape_cast %208 : vector<1x16x2xf32> to vector<16x2xf32>
    %210 = vector.shape_cast %207 : vector<16x2xf32> to vector<1x16x2xf32>
    tpu.vector_store %arg5[%c0_144, %c0_145, %c0_146], %210 {strides = array<i32>} : memref<1x16x2xf32, #tpu.memory_space<vmem>>, vector<1x16x2xf32>,
    return
  }
  func.func @transform_0(%arg0: i32) -> (i32, i32, i32) {
    %c0_i32 = arith.constant 0 : i32
    %c0_i32_0 = arith.constant 0 : i32
    %c0_i32_1 = arith.constant 0 : i32
    return %arg0, %c0_i32, %c0_i32_0 : i32, i32, i32
  }
  func.func @transform_1(%arg0: i32) -> (i32, i32, i32) {
    %c0_i32 = arith.constant 0 : i32
    %c0_i32_0 = arith.constant 0 : i32
    %c0_i32_1 = arith.constant 0 : i32
    %c0_i32_2 = arith.constant 0 : i32
    return %c0_i32, %c0_i32_0, %c0_i32_1 : i32, i32, i32
  }
  func.func @transform_2(%arg0: i32) -> (i32, i32) {
    %c0_i32 = arith.constant 0 : i32
    %c0_i32_0 = arith.constant 0 : i32
    %c0_i32_1 = arith.constant 0 : i32
    return %c0_i32, %c0_i32_0 : i32, i32
  }
  func.func @transform_3(%arg0: i32) -> (i32, i32, i32) {
    %c0_i32 = arith.constant 0 : i32
    %c0_i32_0 = arith.constant 0 : i32
    %c0_i32_1 = arith.constant 0 : i32
    return %arg0, %c0_i32, %c0_i32_0 : i32, i32, i32
  }
  func.func @transform_4(%arg0: i32) -> (i32, i32, i32) {
    %c0_i32 = arith.constant 0 : i32
    %c0_i32_0 = arith.constant 0 : i32
    %c0_i32_1 = arith.constant 0 : i32
    return %arg0, %c0_i32, %c0_i32_0 : i32, i32, i32
  }
}

</mosaic_0001>

<bundles_post_ra>
// kernel: pixel_shuffle_upsampling.3
= control target key start
LH: loop header
LB: loop body
LE: loop exit
PB: predicated region body
PF: predicated region fallthrough
CT: control target
= control target key end

     0   :  { %v107_v0 = vmov 0   ;;  %s196_s2 = inlined_call_operand.vmem [shape: f32[16,1], index: 2, kind: input, shape index: {}]   ;;  %s197_s1 = inlined_call_operand.vmem [shape: f32[16,1], index: 1, kind: input, shape index: {}]   ;;  %s198_s0 = inlined_call_operand.vmem [shape: f32[2,16,256], index: 0, kind: input, shape index: {}]   ;;  %s199_s3 = inlined_call_operand.<no memory space> [shape: f32[1,1], index: 3, kind: input, shape index: {}]   ;;  %s200_s4 = inlined_call_operand.vmem [shape: f32[2,16,256], index: 4, kind: output, shape index: {}]  }
   0x1   :  { %106 = vset.pattern.permute.xlu1 %v107_v0  ;;  %105 = vset.pattern.permute.xlu0 %v107_v0  ;;  %v46_v1 = vld [vmem:[%s196_s2] sm:$0xff]  ;;  %v47_v3 = vld [vmem:[%s196_s2 + $0x8] sm:$0xff]  ;;  %v75_v15 = vstv %s199_s3  ;;  %v20_v20 = vld [vmem:[%s198_s0 + $0x10] sm:$0xff] }
   0x2   :  { %v26_v2 = vld [vmem:[%s197_s1] sm:$0xff]  ;;  %50 = vperm.xlu1 %106, %v46_v1   ;;  %v27_v4 = vld [vmem:[%s197_s1 + $0x8] sm:$0xff]  ;;  %v21_v22 = vld [vmem:[%s198_s0 + $0x18] sm:$0xff] }
   0x3   :  { %30 = vperm.xlu0 %105, %v26_v2   ;;  %v18_v5 = vld [vmem:[%s198_s0] sm:$0xff]  ;;  %v19_v6 = vld [vmem:[%s198_s0 + $0x8] sm:$0xff]  ;;  %v24_v23 = vld [vmem:[%s198_s0 + $0x30] sm:$0xff] }
   0x4   :  { %v22_v7 = vld [vmem:[%s198_s0 + $0x20] sm:$0xff]  ;;  %v23_v8 = vld [vmem:[%s198_s0 + $0x28] sm:$0xff]  ;;  %v25_v24 = vld [vmem:[%s198_s0 + $0x38] sm:$0xff] }
   0x6   :  { %55 = vperm.xlu1 %106, %v47_v3  }
   0x7   :  { %35 = vperm.xlu0 %105, %v27_v4  }
  0x81   :  { %v51_v14 = vpop.permute.xlu1 %50 }
  0x82   :  { %v31_v9 = vpop.permute.xlu0 %30 }
  0x83   :  { %v38_v10 = vmul.f32 %v31_v9, %v18_v5  ;;  %v39_v11 = vmul.f32 %v31_v9, %v19_v6  ;;  %v42_v12 = vmul.f32 %v31_v9, %v22_v7  ;;  %v43_v13 = vmul.f32 %v31_v9, %v23_v8 }
  0x85   :  { %v58_v16 = vadd.f32 %v51_v14, %v38_v10  ;;  %v59_v17 = vadd.f32 %v51_v14, %v39_v11  ;;  %v62_v18 = vadd.f32 %v51_v14, %v42_v12  ;;  %v63_v19 = vadd.f32 %v51_v14, %v43_v13  ;;  %v56_v37 = vpop.permute.xlu1 %55 }
  0x86   :  { %v36_v21 = vpop.permute.xlu0 %35 }
  0x87   :  { %vm67_vm0 = vcmp.ge.f32.partialorder %v58_v16, 0.0  ;;  %vm68_vm1 = vcmp.ge.f32.partialorder %v59_v17, 0.0  ;;  %vm71_vm2 = vcmp.ge.f32.partialorder %v62_v18, 0.0  ;;  %vm72_vm3 = vcmp.ge.f32.partialorder %v63_v19, 0.0 }
  0x88   :  { %v76_v25 = vmul.f32 %v75_v15, %v58_v16  ;;  %v77_v26 = vmul.f32 %v75_v15, %v59_v17  ;;  %v80_v27 = vmul.f32 %v75_v15, %v62_v18  ;;  %v81_v28 = vmul.f32 %v75_v15, %v63_v19 }
  0x89   :  { %v40_v29 = vmul.f32 %v36_v21, %v20_v20  ;;  %v41_v30 = vmul.f32 %v36_v21, %v21_v22  ;;  %v44_v31 = vmul.f32 %v36_v21, %v24_v23  ;;  %v45_v32 = vmul.f32 %v36_v21, %v25_v24 }
  0x8a   :  { %v84_v33 = vsel %vm67_vm0, %v58_v16, %v76_v25  ;;  %v85_v34 = vsel %vm68_vm1, %v59_v17, %v77_v26  ;;  %v88_v35 = vsel %vm71_vm2, %v62_v18, %v80_v27  ;;  %v89_v36 = vsel %vm72_vm3, %v63_v19, %v81_v28 }
  0x8b   :  { %92 = vst [vmem:[%s200_s4] sm:$0xff] %v84_v33  ;;  %93 = vst [vmem:[%s200_s4 + $0x8] sm:$0xff] %v85_v34  ;;  %v60_v38 = vadd.f32 %v56_v37, %v40_v29  ;;  %v61_v39 = vadd.f32 %v56_v37, %v41_v30  ;;  %v64_v40 = vadd.f32 %v56_v37, %v44_v31 }
  0x8c   :  { %96 = vst [vmem:[%s200_s4 + $0x20] sm:$0xff] %v88_v35  ;;  %97 = vst [vmem:[%s200_s4 + $0x28] sm:$0xff] %v89_v36  ;;  %v65_v41 = vadd.f32 %v56_v37, %v45_v32 }
  0x8d   :  { %vm69_vm4 = vcmp.ge.f32.partialorder %v60_v38, 0.0  ;;  %vm70_vm5 = vcmp.ge.f32.partialorder %v61_v39, 0.0  ;;  %vm73_vm6 = vcmp.ge.f32.partialorder %v64_v40, 0.0  ;;  %v78_v42 = vmul.f32 %v75_v15, %v60_v38 }
  0x8e   :  { %vm74_vm7 = vcmp.ge.f32.partialorder %v65_v41, 0.0  ;;  %v79_v43 = vmul.f32 %v75_v15, %v61_v39  ;;  %v82_v44 = vmul.f32 %v75_v15, %v64_v40  ;;  %v83_v45 = vmul.f32 %v75_v15, %v65_v41 }
  0x8f   :  { %v86_v46 = vsel %vm69_vm4, %v60_v38, %v78_v42 }
  0x90   :  { %v87_v47 = vsel %vm70_vm5, %v61_v39, %v79_v43  ;;  %v90_v48 = vsel %vm73_vm6, %v64_v40, %v82_v44  ;;  %v91_v49 = vsel %vm74_vm7, %v65_v41, %v83_v45  ;;  %94 = vst [vmem:[%s200_s4 + $0x10] sm:$0xff] %v86_v46 }
  0x91   :  { %95 = vst [vmem:[%s200_s4 + $0x18] sm:$0xff] %v87_v47  ;;  %98 = vst [vmem:[%s200_s4 + $0x30] sm:$0xff] %v90_v48 }
  0x92   :  { %99 = vst [vmem:[%s200_s4 + $0x38] sm:$0xff] %v91_v49 }

// kernel: pixel_shuffle_upsampling.2
= control target key start
LH: loop header
LB: loop body
LE: loop exit
PB: predicated region body
PF: predicated region fallthrough
CT: control target
= control target key end

     0   :  { %s2307_s21 = smov 127   ;;  %v2308_v6 = vmov 0.0   ;;  %s2309_s26 = smov 126   ;;  %v2316_v21 = vmov 0   ;;  %v16_v24 = vlaneseq  ;;  %vm70_vm0 = vcmask 1039360   ;;  %s2738_s0 = inlined_call_operand.vmem [shape: f32[2,4,290], index: 0, kind: input, shape index: {}]   ;;  %s2739_s2 = inlined_call_operand.vmem [shape: f32[16,1], index: 2, kind: input, shape index: {}]   ;;  %s2740_s1 = inlined_call_operand.vmem [shape: f32[9,16,4], index: 1, kind: input, shape index: {}]   ;;  %s2741_s3 = inlined_call_operand.vmem [shape: f32[2,16,256], index: 3, kind: output, shape index: {0}]   ;;  %s2742_s4 = inlined_call_operand.vmem [shape: f32[1,16,2], index: 4, kind: output, shape index: {1}]  }
   0x1   :  { %v2158_v0 = vld [vmem:[%s2738_s0 + $0x14] sm:$0xf]  ;;  %v59_v1 = vld [vmem:[%s2738_s0 + $0x8] sm:$0xf]  ;;  %v2351_v2 = vld [vmem:[%s2738_s0 + $0xc] sm:$0xff]  ;;  %149 = vmatprep.mubr.f32.mxu0 %v2308_v6  ;;  %1176 = vmatprep.mubr.f32.mxu1 %v2308_v6  ;;  %s2310_s5 = smov 112  }
   0x2   :  { %1098 = vrot.lane.b32.xlu1 %v2158_v0, %s2307_s21  ;;  %68 = vrot.lane.b32.xlu0 %v59_v1, %s2307_s21  ;;  %v2355_v3 = vcombine.high %v2351_v2, %v2351_v2  ;;  %v2360_v4 = vld [vmem:[%s2738_s0] sm:$0xff]  ;;  %v252_v7 = vld [vmem:[%s2738_s0 + $0x8] sm:$0xf]  ;;  %s2311_s10 = smov 111   ;;  %s2312_s15 = smov 110   ;;  %v17_v25 = vand.u32 127, %v16_v24 }
   0x3   :  { %v2364_v5 = vcombine.high %v2360_v4, %v2360_v4  ;;  %v2170_v8 = vld [vmem:[%s2738_s0 + $0x14] sm:$0xf]  ;;  %v370_v9 = vld [vmem:[%s2738_s0 + $0x8] sm:$0xf]  ;;  %s2313_s20 = smov 96   ;;  %s2314_s25 = smov 95   ;;  %2304 = vset.pattern.permute.xlu1 %v2316_v21  ;;  %2303 = vset.pattern.permute.xlu0 %v2316_v21 }
   0x4   :  { %v2178_v10 = vld [vmem:[%s2738_s0 + $0x14] sm:$0xf]  ;;  %v484_v11 = vld [vmem:[%s2738_s0 + $0x8] sm:$0xf]  ;;  %s2315_s30 = smov 94   ;;  %v2050_v23 = vld [vmem:[%s2739_s2] sm:$0xff] }
   0x5   :  { %v2186_v12 = vld [vmem:[%s2738_s0 + $0x14] sm:$0xf]  ;;  %v592_v13 = vld [vmem:[%s2738_s0 + $0x8] sm:$0xf]  ;;  %v18_v26 = vadd.s32 128, %v17_v25  ;;  %v23_v30 = vand.u32 15, %v17_v25 }
   0x6   :  { %1096 = vrot.lane.b32.xlu1 %v2355_v3, %s2307_s21  ;;  %66 = vrot.lane.b32.xlu0 %v2364_v5, %s2307_s21  ;;  %v2194_v14 = vld [vmem:[%s2738_s0 + $0x14] sm:$0xf]  ;;  %v706_v15 = vld [vmem:[%s2738_s0 + $0x8] sm:$0xf]  ;;  %vm80_vm1 = vcmask 1043456   ;;  %vm73_vm4 = vcmask 31744  }
   0x7   :  { %v2202_v16 = vld [vmem:[%s2738_s0 + $0x14] sm:$0xf]  ;;  %v820_v17 = vld [vmem:[%s2738_s0 + $0x8] sm:$0xf]  ;;  %v30_v29 = vand.u32 15, %v18_v26  ;;  %vm2456_vm3 = vcmp.eq.s32.totalorder %v23_v30, 0 }
   0x8   :  { %v2210_v18 = vld [vmem:[%s2738_s0 + $0x14] sm:$0xf]  ;;  %v928_v19 = vld [vmem:[%s2738_s0 + $0x8] sm:$0xf]  ;;  %v55_v43 = vsel %vm2456_vm3, 0.0, %v2360_v4  ;;  %vm266_vm5 = vcmask 1031168  }
   0x9   :  { %v2218_v20 = vld [vmem:[%s2738_s0 + $0x14] sm:$0xf]  ;;  %v1042_v22 = vld [vmem:[%s2739_s2 + $0x8] sm:$0xff]  ;;  %vm2450_vm2 = vcmp.eq.s32.totalorder %v30_v29, 0  ;;  %vm2476_vm6 = vcmp.eq.s32.totalorder %v30_v29, 15  ;;  %v1086_v46 = vsel %vm2456_vm3, 0.0, %v2351_v2 }
   0xa   :  { %1094 = vrot.lane.b32.xlu1 %v2351_v2, %s2307_s21  ;;  %64 = vrot.lane.b32.xlu0 %v2360_v4, %s2307_s21  ;;  %v56_v39 = vsel %vm2450_vm2, 0.0, %v2364_v5  ;;  %v2105_v40 = vld [vmem:[%s2740_s1 + $0x10] sm:$0xff]  ;;  %v1087_v44 = vsel %vm2450_vm2, 0.0, %v2355_v3  ;;  %v2106_v49 = vld [vmem:[%s2740_s1 + $0x18] sm:$0xff]  ;;  %vm2509_vm7 = vcmp.eq.s32.totalorder %v23_v30, 15  ;;  %vm380_vm8 = vcmask 916480  }
   0xb   :  { %v57_v54 = vld [vmem:[%s2740_s1] sm:$0xff]  ;;  %v58_v62 = vld [vmem:[%s2740_s1 + $0x8] sm:$0xff]  ;;  %vm497_vm9 = vcmask 908288   ;;  %vm602_vm10 = vcmask 900096   ;;  %vm716_vm11 = vcmask 785408   ;;  %vm833_vm12 = vcmask 777216  }
   0xc   :  { %v2204_v36 = vld [vmem:[%s2740_s1 + $0x68] sm:$0xff]  ;;  %vm938_vm13 = vcmask 769024   ;;  %vm2091_vm14 = vcmask 7168   ;;  %vm2094_vm15 = vcmask 15360  }
   0xd   :  { %v2152_v45 = vld [vmem:[%s2740_s1 + $0x88] sm:$0xff] }
   0xe   :  { %264 = vrot.lane.b32.xlu1 %v252_v7, %s2309_s26  ;;  %262 = vrot.lane.b32.xlu0 %v2364_v5, %s2309_s26 }
  0x12   :  { %1287 = vrot.lane.b32.xlu1 %v2170_v8, %s2309_s26  ;;  %1285 = vrot.lane.b32.xlu0 %v2355_v3, %s2309_s26 }
  0x16   :  { %1283 = vrot.lane.b32.xlu1 %v2351_v2, %s2309_s26  ;;  %260 = vrot.lane.b32.xlu0 %v2360_v4, %s2309_s26 }
  0x1a   :  { %378 = vrot.lane.b32.xlu1 %v370_v9, %s2310_s5  ;;  %376 = vrot.lane.b32.xlu0 %v2364_v5, %s2310_s5 }
  0x1e   :  { %1399 = vrot.lane.b32.xlu1 %v2178_v10, %s2310_s5  ;;  %1397 = vrot.lane.b32.xlu0 %v2355_v3, %s2310_s5  ;;  %v2116_v10 = vld [vmem:[%s2740_s1 + $0x28] sm:$0xff] }
  0x22   :  { %1395 = vrot.lane.b32.xlu1 %v2351_v2, %s2310_s5  ;;  %374 = vrot.lane.b32.xlu0 %v2360_v4, %s2310_s5 }
  0x26   :  { %495 = vrot.lane.b32.xlu1 %v484_v11, %s2311_s10  ;;  %493 = vrot.lane.b32.xlu0 %v2364_v5, %s2311_s10 }
  0x2a   :  { %1513 = vrot.lane.b32.xlu1 %v2186_v12, %s2311_s10  ;;  %1511 = vrot.lane.b32.xlu0 %v2355_v3, %s2311_s10 }
  0x2e   :  { %1509 = vrot.lane.b32.xlu1 %v2351_v2, %s2311_s10  ;;  %491 = vrot.lane.b32.xlu0 %v2360_v4, %s2311_s10 }
  0x32   :  { %600 = vrot.lane.b32.xlu1 %v592_v13, %s2312_s15  ;;  %598 = vrot.lane.b32.xlu0 %v2364_v5, %s2312_s15 }
  0x36   :  { %1617 = vrot.lane.b32.xlu1 %v2194_v14, %s2312_s15  ;;  %1615 = vrot.lane.b32.xlu0 %v2355_v3, %s2312_s15 }
  0x3a   :  { %1613 = vrot.lane.b32.xlu1 %v2351_v2, %s2312_s15  ;;  %596 = vrot.lane.b32.xlu0 %v2360_v4, %s2312_s15 }
  0x3e   :  { %714 = vrot.lane.b32.xlu1 %v706_v15, %s2313_s20  ;;  %712 = vrot.lane.b32.xlu0 %v2364_v5, %s2313_s20 }
  0x42   :  { %1729 = vrot.lane.b32.xlu1 %v2202_v16, %s2313_s20  ;;  %1727 = vrot.lane.b32.xlu0 %v2355_v3, %s2313_s20  ;;  %v2121_v16 = vld [vmem:[%s2740_s1 + $0x30] sm:$0xff] }
  0x46   :  { %1725 = vrot.lane.b32.xlu1 %v2351_v2, %s2313_s20  ;;  %710 = vrot.lane.b32.xlu0 %v2360_v4, %s2313_s20 }
  0x4a   :  { %831 = vrot.lane.b32.xlu1 %v820_v17, %s2314_s25  ;;  %829 = vrot.lane.b32.xlu0 %v2364_v5, %s2314_s25 }
  0x4e   :  { %1843 = vrot.lane.b32.xlu1 %v2210_v18, %s2314_s25  ;;  %1841 = vrot.lane.b32.xlu0 %v2355_v3, %s2314_s25 }
  0x52   :  { %1839 = vrot.lane.b32.xlu1 %v2351_v2, %s2314_s25  ;;  %827 = vrot.lane.b32.xlu0 %v2360_v4, %s2314_s25 }
  0x56   :  { %936 = vrot.lane.b32.xlu1 %v928_v19, %s2315_s30  ;;  %934 = vrot.lane.b32.xlu0 %v2364_v5, %s2315_s30 }
  0x5a   :  { %1947 = vrot.lane.b32.xlu1 %v2218_v20, %s2315_s30  ;;  %1945 = vrot.lane.b32.xlu0 %v2355_v3, %s2315_s30 }
  0x5e   :  { %1943 = vrot.lane.b32.xlu1 %v2351_v2, %s2315_s30  ;;  %932 = vrot.lane.b32.xlu0 %v2360_v4, %s2315_s30  ;;  %v2115_v4 = vld [vmem:[%s2740_s1 + $0x20] sm:$0xff] }
  0x62   :  { %1050 = vperm.xlu1 %2304, %v1042_v22   ;;  %1045 = vperm.xlu0 %2303, %v2050_v23  }
  0x66   :  { %2054 = vperm.xlu1 %2304, %v2050_v23   ;;  %2059 = vperm.xlu0 %2303, %v1042_v22   ;;  %v2122_v22 = vld [vmem:[%s2740_s1 + $0x38] sm:$0xff] }
  0x74   :  { %v1099_v27 = vpop.permute.xlu1 %1098  ;;  %v69_v28 = vpop.permute.xlu0 %68 }
  0x78   :  { %v1097_v31 = vpop.permute.xlu1 %1096  ;;  %v67_v32 = vpop.permute.xlu0 %66 }
  0x79   :  { %v72_v33 = vsel %vm70_vm0, %v67_v32, %v69_v28  ;;  %v1101_v34 = vsel %vm70_vm0, %v1097_v31, %v1099_v27  ;;  %v2127_v28 = vld [vmem:[%s2740_s1 + $0x40] sm:$0xff] }
  0x7a   :  { %2107 = vmatprep.subr.msk.mxu0 %vm80_vm1, %v72_v33  ;;  %2161 = vmatprep.subr.msk.mxu1 %vm80_vm1, %v1101_v34  ;;  %v2128_v33 = vld [vmem:[%s2740_s1 + $0x48] sm:$0xff] }
  0x7c   :  { %v1095_v37 = vpop.permute.xlu1 %1094  ;;  %v65_v38 = vpop.permute.xlu0 %64 }
  0x7d   :  { %v71_v41 = vsel %vm70_vm0, %v65_v38, %v67_v32  ;;  %v1100_v42 = vsel %vm70_vm0, %v1095_v37, %v1097_v31 }
  0x7e   :  { %2108 = vmatpush1.msk.msra.mxu0 %vm80_vm1, %v71_v41  ;;  %2162 = vmatpush1.msk.msra.mxu1 %vm80_vm1, %v1100_v42 }
  0x7f   :  { %2111 = vmatprep.subr.msk.mxu0 %vm80_vm1, %v56_v39  ;;  %2109 = vmatmul.mubr.msk.f32.vlgmr.msra.gmra.mrb[0].mxu0 %vm73_vm4, %v2105_v40 }
  0x80   :  { %v265_v47 = vpop.permute.xlu1 %264  ;;  %v263_v48 = vpop.permute.xlu0 %262  ;;  %2112 = vmatpush1.msk.msra.mxu0 %vm80_vm1, %v55_v43  ;;  %2163 = vmatmul.mubr.msk.f32.vlgmr.msra.gmra.mrb[0].mxu1 %vm73_vm4, %v2105_v40 }
  0x81   :  { %v268_v50 = vsel %vm266_vm5, %v263_v48, %v265_v47  ;;  %2165 = vmatprep.subr.msk.mxu1 %vm80_vm1, %v1087_v44  ;;  %155 = vmatprep.mubr.f32.mxu0 %v2308_v6  ;;  %v2133_v47 = vld [vmem:[%s2740_s1 + $0x50] sm:$0xff] }
  0x82   :  { %v272_v51 = vsel %vm2476_vm6, 0.0, %v268_v50  ;;  %1182 = vmatprep.mubr.f32.mxu1 %v2308_v6  ;;  %2166 = vmatpush1.msk.msra.mxu1 %vm80_vm1, %v1086_v46 }
  0x83   :  { %2117 = vmatprep.subr.msk.mxu0 %vm80_vm1, %v272_v51  ;;  %2110 = vmatmul.mubr.msk.f32.gmra.mrb[2].mxu0 %vm73_vm4, %v2106_v49 }
  0x84   :  { %v1288_v52 = vpop.permute.xlu1 %1287  ;;  %v1286_v53 = vpop.permute.xlu0 %1285  ;;  %2164 = vmatmul.mubr.msk.f32.gmra.mrb[2].mxu1 %vm73_vm4, %v2106_v49  ;;  %238 = vmatprep.mubr.f32.mxu0 %v2308_v6 }
  0x85   :  { %v1290_v55 = vsel %vm266_vm5, %v1286_v53, %v1288_v52  ;;  %1265 = vmatprep.mubr.f32.mxu1 %v2308_v6 }
  0x86   :  { %v1294_v56 = vsel %vm2476_vm6, 0.0, %v1290_v55 }
  0x87   :  { %2173 = vmatprep.subr.msk.mxu1 %vm80_vm1, %v1294_v56  ;;  %2113 = vmatmul.mubr.msk.f32.vlgmr.msra.gmra.mrb[0].mxu0 %vm73_vm4, %v57_v54 }
  0x88   :  { %v1284_v58 = vpop.permute.xlu1 %1283  ;;  %v261_v59 = vpop.permute.xlu0 %260  ;;  %2167 = vmatmul.mubr.msk.f32.vlgmr.msra.gmra.mrb[0].mxu1 %vm73_vm4, %v57_v54  ;;  %244 = vmatprep.mubr.f32.mxu0 %v2308_v6 }
  0x89   :  { %v1289_v60 = vsel %vm266_vm5, %v1284_v58, %v1286_v53  ;;  %v267_v61 = vsel %vm266_vm5, %v261_v59, %v263_v48  ;;  %1271 = vmatprep.mubr.f32.mxu1 %v2308_v6  ;;  %v2196_v53 = vld [vmem:[%s2740_s1 + $0x58] sm:$0xff] }
  0x8a   :  { %v1293_v63 = vsel %vm2509_vm7, 0.0, %v1289_v60  ;;  %v271_v0 = vsel %vm2509_vm7, 0.0, %v267_v61 }
  0x8b   :  { %2118 = vmatpush1.msk.msra.mxu0 %vm80_vm1, %v271_v0  ;;  %2174 = vmatpush1.msk.msra.mxu1 %vm80_vm1, %v1293_v63  ;;  %v2203_v0 = vld [vmem:[%s2740_s1 + $0x60] sm:$0xff] }
  0x8c   :  { %v379_v1 = vpop.permute.xlu1 %378  ;;  %v377_v2 = vpop.permute.xlu0 %376  ;;  %2114 = vmatmul.mubr.msk.f32.gmra.mrb[2].mxu0 %vm73_vm4, %v58_v62  ;;  %2168 = vmatmul.mubr.msk.f32.gmra.mrb[2].mxu1 %vm73_vm4, %v58_v62 }
  0x8d   :  { %v382_v3 = vsel %vm380_vm8, %v377_v2, %v379_v1  ;;  %352 = vmatprep.mubr.f32.mxu0 %v2308_v6  ;;  %1373 = vmatprep.mubr.f32.mxu1 %v2308_v6 }
  0x8e   :  { %v386_v5 = vsel %vm2450_vm2, 0.0, %v382_v3 }
  0x8f   :  { %2123 = vmatprep.subr.msk.mxu0 %vm80_vm1, %v386_v5 }
  0x90   :  { %v1400_v7 = vpop.permute.xlu1 %1399  ;;  %v1398_v8 = vpop.permute.xlu0 %1397  ;;  %2119 = vmatmul.mubr.msk.f32.vlgmr.msra.gmra.mrb[0].mxu0 %vm73_vm4, %v2115_v4  ;;  %2175 = vmatmul.mubr.msk.f32.vlgmr.msra.gmra.mrb[0].mxu1 %vm73_vm4, %v2115_v4 }
  0x91   :  { %v1402_v9 = vsel %vm380_vm8, %v1398_v8, %v1400_v7  ;;  %358 = vmatprep.mubr.f32.mxu0 %v2308_v6  ;;  %1379 = vmatprep.mubr.f32.mxu1 %v2308_v6 }
  0x92   :  { %v1406_v11 = vsel %vm2450_vm2, 0.0, %v1402_v9 }
  0x93   :  { %2181 = vmatprep.subr.msk.mxu1 %vm80_vm1, %v1406_v11  ;;  %v2211_v11 = vld [vmem:[%s2740_s1 + $0x70] sm:$0xff] }
  0x94   :  { %v1396_v12 = vpop.permute.xlu1 %1395  ;;  %v375_v13 = vpop.permute.xlu0 %374  ;;  %2120 = vmatmul.mubr.msk.f32.gmra.mrb[2].mxu0 %vm73_vm4, %v2116_v10  ;;  %2176 = vmatmul.mubr.msk.f32.gmra.mrb[2].mxu1 %vm73_vm4, %v2116_v10 }
  0x95   :  { %v1401_v14 = vsel %vm380_vm8, %v1396_v12, %v1398_v8  ;;  %v381_v15 = vsel %vm380_vm8, %v375_v13, %v377_v2  ;;  %466 = vmatprep.mubr.f32.mxu0 %v2308_v6  ;;  %1485 = vmatprep.mubr.f32.mxu1 %v2308_v6 }
  0x96   :  { %v1405_v17 = vsel %vm2456_vm3, 0.0, %v1401_v14  ;;  %v385_v18 = vsel %vm2456_vm3, 0.0, %v381_v15 }
  0x97   :  { %2124 = vmatpush1.msk.msra.mxu0 %vm80_vm1, %v385_v18  ;;  %2182 = vmatpush1.msk.msra.mxu1 %vm80_vm1, %v1405_v17 }
  0x98   :  { %v496_v19 = vpop.permute.xlu1 %495  ;;  %v494_v20 = vpop.permute.xlu0 %493  ;;  %2125 = vmatmul.mubr.msk.f32.vlgmr.msra.gmra.mrb[0].mxu0 %vm73_vm4, %v2121_v16  ;;  %2183 = vmatmul.mubr.msk.f32.vlgmr.msra.gmra.mrb[0].mxu1 %vm73_vm4, %v2121_v16  ;;  %v2212_v16 = vld [vmem:[%s2740_s1 + $0x78] sm:$0xff] }
  0x99   :  { %v499_v21 = vsel %vm497_vm9, %v494_v20, %v496_v19  ;;  %472 = vmatprep.mubr.f32.mxu0 %v2308_v6  ;;  %1491 = vmatprep.mubr.f32.mxu1 %v2308_v6 }
  0x9a   :  { %2129 = vmatprep.subr.msk.mxu0 %vm80_vm1, %v499_v21 }
  0x9c   :  { %v1514_v23 = vpop.permute.xlu1 %1513  ;;  %v1512_v24 = vpop.permute.xlu0 %1511  ;;  %2126 = vmatmul.mubr.msk.f32.gmra.mrb[2].mxu0 %vm73_vm4, %v2122_v22  ;;  %2184 = vmatmul.mubr.msk.f32.gmra.mrb[2].mxu1 %vm73_vm4, %v2122_v22 }
  0x9d   :  { %v1516_v25 = vsel %vm497_vm9, %v1512_v24, %v1514_v23  ;;  %574 = vmatprep.mubr.f32.mxu0 %v2308_v6  ;;  %1591 = vmatprep.mubr.f32.mxu1 %v2308_v6 }
  0x9e   :  { %2189 = vmatprep.subr.msk.mxu1 %vm80_vm1, %v1516_v25 }
  0xa0   :  { %v1510_v26 = vpop.permute.xlu1 %1509  ;;  %v492_v27 = vpop.permute.xlu0 %491 }
  0xa1   :  { %v1515_v29 = vsel %vm497_vm9, %v1510_v26, %v1512_v24  ;;  %v498_v30 = vsel %vm497_vm9, %v492_v27, %v494_v20  ;;  %v2151_v27 = vld [vmem:[%s2740_s1 + $0x80] sm:$0xff] }
  0xa2   :  { %2130 = vmatpush1.msk.msra.mxu0 %vm80_vm1, %v498_v30  ;;  %2190 = vmatpush1.msk.msra.mxu1 %vm80_vm1, %v1515_v29 }
  0xa3   :  { %2131 = vmatmul.mubr.msk.f32.vlgmr.msra.gmra.mrb[0].mxu0 %vm73_vm4, %v2127_v28  ;;  %2191 = vmatmul.mubr.msk.f32.vlgmr.msra.gmra.mrb[0].mxu1 %vm73_vm4, %v2127_v28 }
  0xa4   :  { %v601_v31 = vpop.permute.xlu1 %600  ;;  %v599_v32 = vpop.permute.xlu0 %598  ;;  %580 = vmatprep.mubr.f32.mxu0 %v2308_v6  ;;  %1597 = vmatprep.mubr.f32.mxu1 %v2308_v6 }
  0xa5   :  { %v604_v34 = vsel %vm602_vm10, %v599_v32, %v601_v31 }
  0xa6   :  { %v608_v37 = vsel %vm2476_vm6, 0.0, %v604_v34 }
  0xa7   :  { %2135 = vmatprep.subr.msk.mxu0 %vm80_vm1, %v608_v37  ;;  %2132 = vmatmul.mubr.msk.f32.gmra.mrb[2].mxu0 %vm73_vm4, %v2128_v33 }
  0xa8   :  { %v1618_v38 = vpop.permute.xlu1 %1617  ;;  %v1616_v39 = vpop.permute.xlu0 %1615  ;;  %2192 = vmatmul.mubr.msk.f32.gmra.mrb[2].mxu1 %vm73_vm4, %v2128_v33  ;;  %688 = vmatprep.mubr.f32.mxu0 %v2308_v6 }
  0xa9   :  { %v1620_v40 = vsel %vm602_vm10, %v1616_v39, %v1618_v38  ;;  %1703 = vmatprep.mubr.f32.mxu1 %v2308_v6 }
  0xaa   :  { %v1624_v41 = vsel %vm2476_vm6, 0.0, %v1620_v40 }
  0xab   :  { %2197 = vmatprep.subr.msk.mxu1 %vm80_vm1, %v1624_v41 }
  0xac   :  { %v1614_v42 = vpop.permute.xlu1 %1613  ;;  %v597_v43 = vpop.permute.xlu0 %596 }
  0xad   :  { %v1619_v44 = vsel %vm602_vm10, %v1614_v42, %v1616_v39  ;;  %v603_v46 = vsel %vm602_vm10, %v597_v43, %v599_v32 }
  0xae   :  { %v1623_v48 = vsel %vm2509_vm7, 0.0, %v1619_v44  ;;  %v607_v49 = vsel %vm2509_vm7, 0.0, %v603_v46 }
  0xaf   :  { %2136 = vmatpush1.msk.msra.mxu0 %vm80_vm1, %v607_v49  ;;  %2198 = vmatpush1.msk.msra.mxu1 %vm80_vm1, %v1623_v48 }
  0xb0   :  { %v715_v50 = vpop.permute.xlu1 %714  ;;  %v713_v51 = vpop.permute.xlu0 %712  ;;  %2137 = vmatmul.mubr.msk.f32.vlgmr.msra.gmra.mrb[0].mxu0 %vm73_vm4, %v2133_v47  ;;  %2199 = vmatmul.mubr.msk.f32.vlgmr.msra.gmra.mrb[0].mxu1 %vm73_vm4, %v2133_v47 }
  0xb1   :  { %v718_v52 = vsel %vm716_vm11, %v713_v51, %v715_v50  ;;  %694 = vmatprep.mubr.f32.mxu0 %v2308_v6  ;;  %1709 = vmatprep.mubr.f32.mxu1 %v2308_v6 }
  0xb2   :  { %v722_v54 = vsel %vm2450_vm2, 0.0, %v718_v52 }
  0xb3   :  { %2141 = vmatprep.subr.msk.mxu0 %vm80_vm1, %v722_v54 }
  0xb4   :  { %v1730_v55 = vpop.permute.xlu1 %1729  ;;  %v1728_v56 = vpop.permute.xlu0 %1727  ;;  %2200 = vmatmul.mubr.msk.f32.gmra.mrb[2].mxu1 %vm73_vm4, %v2196_v53  ;;  %2138 = vmatmul.mubr.msk.f32.gmra.mrb[2].mxu0 %vm73_vm4, %v2196_v53 }
  0xb5   :  { %v1732_v58 = vsel %vm716_vm11, %v1728_v56, %v1730_v55  ;;  %802 = vmatprep.mubr.f32.mxu0 %v2308_v6  ;;  %1815 = vmatprep.mubr.f32.mxu1 %v2308_v6 }
  0xb6   :  { %v1736_v59 = vsel %vm2450_vm2, 0.0, %v1732_v58 }
  0xb7   :  { %2205 = vmatprep.subr.msk.mxu1 %vm80_vm1, %v1736_v59 }
  0xb8   :  { %v1726_v60 = vpop.permute.xlu1 %1725  ;;  %v711_v61 = vpop.permute.xlu0 %710 }
  0xb9   :  { %v1731_v62 = vsel %vm716_vm11, %v1726_v60, %v1728_v56  ;;  %v717_v63 = vsel %vm716_vm11, %v711_v61, %v713_v51 }
  0xba   :  { %v1735_v1 = vsel %vm2456_vm3, 0.0, %v1731_v62  ;;  %v721_v2 = vsel %vm2456_vm3, 0.0, %v717_v63 }
  0xbb   :  { %2142 = vmatpush1.msk.msra.mxu0 %vm80_vm1, %v721_v2  ;;  %2206 = vmatpush1.msk.msra.mxu1 %vm80_vm1, %v1735_v1 }
  0xbc   :  { %v832_v35 = vpop.permute.xlu1 %831  ;;  %v830_v3 = vpop.permute.xlu0 %829  ;;  %2207 = vmatmul.mubr.msk.f32.vlgmr.msra.gmra.mrb[0].mxu1 %vm73_vm4, %v2203_v0  ;;  %2143 = vmatmul.mubr.msk.f32.vlgmr.msra.gmra.mrb[0].mxu0 %vm73_vm4, %v2203_v0 }
  0xbd   :  { %v835_v4 = vsel %vm833_vm12, %v830_v3, %v832_v35  ;;  %808 = vmatprep.mubr.f32.mxu0 %v2308_v6  ;;  %1821 = vmatprep.mubr.f32.mxu1 %v2308_v6 }
  0xbe   :  { %2147 = vmatprep.subr.msk.mxu0 %vm80_vm1, %v835_v4 }
  0xc0   :  { %v1844_v5 = vpop.permute.xlu1 %1843  ;;  %v1842_v7 = vpop.permute.xlu0 %1841  ;;  %2208 = vmatmul.mubr.msk.f32.gmra.mrb[2].mxu1 %vm73_vm4, %v2204_v36  ;;  %2144 = vmatmul.mubr.msk.f32.gmra.mrb[2].mxu0 %vm73_vm4, %v2204_v36 }
  0xc1   :  { %v1846_v8 = vsel %vm833_vm12, %v1842_v7, %v1844_v5  ;;  %910 = vmatprep.mubr.f32.mxu0 %v2308_v6  ;;  %1921 = vmatprep.mubr.f32.mxu1 %v2308_v6 }
  0xc2   :  { %2213 = vmatprep.subr.msk.mxu1 %vm80_vm1, %v1846_v8 }
  0xc4   :  { %v1840_v9 = vpop.permute.xlu1 %1839  ;;  %v828_v10 = vpop.permute.xlu0 %827 }
  0xc5   :  { %v1845_v12 = vsel %vm833_vm12, %v1840_v9, %v1842_v7  ;;  %v834_v13 = vsel %vm833_vm12, %v828_v10, %v830_v3 }
  0xc6   :  { %2148 = vmatpush1.msk.msra.mxu0 %vm80_vm1, %v834_v13  ;;  %2214 = vmatpush1.msk.msra.mxu1 %vm80_vm1, %v1845_v12 }
  0xc7   :  { %2215 = vmatmul.mubr.msk.f32.vlgmr.msra.gmra.mrb[0].mxu1 %vm73_vm4, %v2211_v11  ;;  %2149 = vmatmul.mubr.msk.f32.vlgmr.msra.gmra.mrb[0].mxu0 %vm73_vm4, %v2211_v11 }
  0xc8   :  { %v937_v14 = vpop.permute.xlu1 %936  ;;  %v935_v15 = vpop.permute.xlu0 %934  ;;  %916 = vmatprep.mubr.f32.mxu0 %v2308_v6  ;;  %1927 = vmatprep.mubr.f32.mxu1 %v2308_v6 }
  0xc9   :  { %v940_v17 = vsel %vm938_vm13, %v935_v15, %v937_v14 }
  0xca   :  { %v944_v18 = vsel %vm2476_vm6, 0.0, %v940_v17 }
  0xcb   :  { %2153 = vmatprep.subr.msk.mxu0 %vm80_vm1, %v944_v18  ;;  %2216 = vmatmul.mubr.msk.f32.gmra.mrb[2].mxu1 %vm73_vm4, %v2212_v16 }
  0xcc   :  { %v1948_v19 = vpop.permute.xlu1 %1947  ;;  %v1946_v20 = vpop.permute.xlu0 %1945  ;;  %2150 = vmatmul.mubr.msk.f32.gmra.mrb[2].mxu0 %vm73_vm4, %v2212_v16  ;;  %2033 = vmatprep.mubr.f32.mxu1 %v2308_v6 }
  0xcd   :  { %v1950_v21 = vsel %vm938_vm13, %v1946_v20, %v1948_v19  ;;  %1024 = vmatprep.mubr.f32.mxu0 %v2308_v6 }
  0xce   :  { %v1954_v22 = vsel %vm2476_vm6, 0.0, %v1950_v21 }
  0xcf   :  { %2221 = vmatprep.subr.msk.mxu1 %vm80_vm1, %v1954_v22 }
  0xd0   :  { %v1944_v23 = vpop.permute.xlu1 %1943  ;;  %v933_v24 = vpop.permute.xlu0 %932 }
  0xd1   :  { %v1949_v25 = vsel %vm938_vm13, %v1944_v23, %v1946_v20  ;;  %v939_v26 = vsel %vm938_vm13, %v933_v24, %v935_v15 }
  0xd2   :  { %v1953_v28 = vsel %vm2509_vm7, 0.0, %v1949_v25  ;;  %v943_v29 = vsel %vm2509_vm7, 0.0, %v939_v26 }
  0xd3   :  { %2154 = vmatpush1.msk.msra.mxu0 %vm80_vm1, %v943_v29  ;;  %2222 = vmatpush1.msk.msra.mxu1 %vm80_vm1, %v1953_v28 }
  0xd4   :  { %2155 = vmatmul.mubr.msk.f32.vlgmr.msra.gmra.mrb[0].mxu0 %vm73_vm4, %v2151_v27  ;;  %2223 = vmatmul.mubr.msk.f32.vlgmr.msra.gmra.mrb[0].mxu1 %vm73_vm4, %v2151_v27 }
  0xd5   :  { %1030 = vmatprep.mubr.f32.mxu0 %v2308_v6  ;;  %2039 = vmatprep.mubr.f32.mxu1 %v2308_v6 }
  0xd8   :  { %2156 = vmatmul.mubr.msk.f32.gmra.mrb[2].mxu0 %vm73_vm4, %v2152_v45  ;;  %2224 = vmatmul.mubr.msk.f32.gmra.mrb[2].mxu1 %vm73_vm4, %v2152_v45 }
  0xe1   :  { %v1051_v57 = vpop.permute.xlu1 %1050  ;;  %v1046_v30 = vpop.permute.xlu0 %1045 }
  0xe5   :  { %v2055_v31 = vpop.permute.xlu1 %2054  ;;  %v2060_v6 = vpop.permute.xlu0 %2059 }
 0x1a7   :  { %v2035_v32 = vpop.f32.mrb[0].mxu1  ;;  %v1026_v33 = vpop.f32.mrb[0].mxu0 }
 0x1a8   :  { %v2062_v34 = vadd.f32 %v2055_v31, %v2035_v32  ;;  %v1053_v37 = vadd.f32 %v1046_v30, %v1026_v33  ;;  %v1028_v38 = vpop.f32.mrb[1].mxu0  ;;  %v2037_v39 = vpop.f32.mrb[1].mxu1 }
 0x1a9   :  { %v1054_v40 = vadd.f32 %v1046_v30, %v1028_v38  ;;  %v2063_v41 = vadd.f32 %v2055_v31, %v2037_v39 }
 0x1aa   :  { %2225 = vst [vmem:[%s2741_s3 + $0x20] sm:$0xff] %v2062_v34  ;;  %1077 = vst [vmem:[%s2741_s3] sm:$0xff] %v1053_v37  ;;  %v1065_v42 = vmul.f32 %v1053_v37, %v1053_v37  ;;  %v2074_v43 = vmul.f32 %v2062_v34, %v2062_v34 }
 0x1ab   :  { %1078 = vst [vmem:[%s2741_s3 + $0x8] sm:$0xff] %v1054_v40  ;;  %2226 = vst [vmem:[%s2741_s3 + $0x28] sm:$0xff] %v2063_v41  ;;  %v2041_v44 = vpop.f32.mrb[2].mxu1  ;;  %v1032_v46 = vpop.f32.mrb[2].mxu0  ;;  %v2066_v47 = vadd.f32 %v2063_v41, %v2062_v34  ;;  %v1057_v48 = vadd.f32 %v1054_v40, %v1053_v37  ;;  %v1066_v49 = vmul.f32 %v1054_v40, %v1054_v40 }
 0x1ac   :  { %v2075_v50 = vmul.f32 %v2063_v41, %v2063_v41  ;;  %v2064_v51 = vadd.f32 %v2060_v6, %v2041_v44  ;;  %v1055_v52 = vadd.f32 %v1051_v57, %v1032_v46  ;;  %v1034_v53 = vpop.f32.mrb[3].mxu0  ;;  %v2043_v54 = vpop.f32.mrb[3].mxu1 }
 0x1ad   :  { %v1056_v55 = vadd.f32 %v1051_v57, %v1034_v53  ;;  %v2065_v56 = vadd.f32 %v2060_v6, %v2043_v54  ;;  %2067 = vadd.xlane.f32.xlu0 %v2066_v47  ;;  %1058 = vadd.xlane.f32.xlu1 %v1057_v48  ;;  %v1069_v58 = vadd.f32 %v1066_v49, %v1065_v42 }
 0x1ae   :  { %2227 = vst [vmem:[%s2741_s3 + $0x30] sm:$0xff] %v2064_v51  ;;  %1079 = vst [vmem:[%s2741_s3 + $0x10] sm:$0xff] %v1055_v52  ;;  %v1067_v59 = vmul.f32 %v1055_v52, %v1055_v52  ;;  %v2076_v60 = vmul.f32 %v2064_v51, %v2064_v51  ;;  %v2078_v61 = vadd.f32 %v2075_v50, %v2074_v43 }
 0x1af   :  { %1080 = vst [vmem:[%s2741_s3 + $0x18] sm:$0xff] %v1056_v55  ;;  %2228 = vst [vmem:[%s2741_s3 + $0x38] sm:$0xff] %v2065_v56  ;;  %v2069_v62 = vadd.f32 %v2065_v56, %v2064_v51  ;;  %v1068_v63 = vmul.f32 %v1056_v55, %v1056_v55  ;;  %v1060_v0 = vadd.f32 %v1056_v55, %v1055_v52 }
 0x1b0   :  { %v2077_v1 = vmul.f32 %v2065_v56, %v2065_v56 }
 0x1b1   :  { %1070 = vadd.xlane.f32.xlu0 %v1069_v58  ;;  %2070 = vadd.xlane.f32.xlu1 %v2069_v62  ;;  %v1072_v2 = vadd.f32 %v1068_v63, %v1067_v59 }
 0x1b2   :  { %v2081_v35 = vadd.f32 %v2077_v1, %v2076_v60 }
 0x1b5   :  { %1073 = vadd.xlane.f32.xlu1 %v1072_v2  ;;  %1061 = vadd.xlane.f32.xlu0 %v1060_v0 }
 0x1b9   :  { %2082 = vadd.xlane.f32.xlu1 %v2081_v35  ;;  %2079 = vadd.xlane.f32.xlu0 %v2078_v61 }
 0x23a   :  { %v2068_v3 = vpop.xlane.xlu0 %2067  ;;  %v1059_v4 = vpop.xlane.xlu1 %1058 }
 0x23b   :  { %v2072_v11 = vadd.f32 %v2068_v3, %v1059_v4 }
 0x23e   :  { %v1071_v36 = vpop.xlane.xlu0 %1070  ;;  %v2071_v5 = vpop.xlane.xlu1 %2070 }
 0x242   :  { %v1074_v7 = vpop.xlane.xlu1 %1073  ;;  %v1062_v8 = vpop.xlane.xlu0 %1061 }
 0x243   :  { %v2073_v12 = vadd.f32 %v2071_v5, %v1062_v8 }
 0x246   :  { %v2083_v9 = vpop.xlane.xlu1 %2082  ;;  %v2080_v10 = vpop.xlane.xlu0 %2079 }
 0x247   :  { %v2085_v13 = vadd.f32 %v2083_v9, %v1074_v7  ;;  %v2084_v14 = vadd.f32 %v2080_v10, %v1071_v36 }
 0x249   :  { %v2093_v15 = vsel %vm2091_vm14, %v2073_v12, %v2085_v13  ;;  %v2092_v16 = vsel %vm2091_vm14, %v2072_v11, %v2084_v14 }
 0x24a   :  { %2096 = vst.msk [vmem:[%s2742_s4 + $0x8] sm:$0xff] %vm2094_vm15, %v2093_v15  ;;  %2095 = vst.msk [vmem:[%s2742_s4] sm:$0xff] %vm2094_vm15, %v2092_v16 }

</bundles_post_ra>
